<compile_context>
chip_gen: v7x
topology: tpu7x:2x2x1
jax: 0.10.0
libtpu: 0.0.40
codegen_flags: <defaults>
</compile_context>

<pallas_src>
from typing import NamedTuple

import jax
import jax.numpy as jnp
from jax.experimental import pallas as pl
from jax.experimental.pallas import tpu as pltpu


_FOLD = 64                 # batch rows folded per slab row -> 64*obs_dim == 128 lanes
_MAX_TILE_SLAB_ROWS = 64   # up to 64 slab rows (4096 batch rows) per grid step

# Flipped to False at runtime if this jax version rejects pl.Buffered(1).
_WEIGHTS_SINGLE_BUFFER = True
_CALL_CACHE = {}


class FoldedDecoderParams(NamedTuple):
    """Block-diagonal ("folded") decoder weights, precomputed once per param set."""
    fold: int
    latent_dim: int
    hidden_size: int
    obs_dim: int
    w1: jax.Array   # [fold*L, fold*H]  bf16 block-diag(W1)
    b1: jax.Array   # [1, fold*H]       f32
    w2: jax.Array   # [fold*H, fold*O]  bf16 block-diag(W2)
    b2: jax.Array   # [1, fold*O]       f32


def _round_up(x, m):
    return ((x + m - 1) // m) * m


def _decoder_kernel(x_ref, w1_ref, b1_ref, w2_ref, b2_ref, o_ref):
    """Fused fc1 -> ReLU -> fc2 on one lane-dense slab tile.

    x_ref : [TSR, G*L]   folded latents (G=64 batch rows per slab row)
    w1_ref: [G*L, G*H]   bf16 block-diag(W1 x G), VMEM-resident across steps
    b1_ref: [1,   G*H]   f32
    w2_ref: [G*H, G*O]   bf16 block-diag(W2 x G), VMEM-resident across steps
    b2_ref: [1,   G*O]   f32
    o_ref : [TSR, G*O]   folded observations (G*O == 128 lanes, dense store)
    """
    # bf16 operands -> single-pass MXU; f32 accumulation via preferred_element_type.
    x = x_ref[...].astype(jnp.bfloat16)          # no-op when input is already bf16
    h = jnp.dot(x, w1_ref[...], preferred_element_type=jnp.float32)
    h = jnp.maximum(h + b1_ref[...], 0.0)        # bias + ReLU in f32
    y = jnp.dot(h.astype(jnp.bfloat16), w2_ref[...],
                preferred_element_type=jnp.float32) + b2_ref[...]
    o_ref[...] = y.astype(o_ref.dtype)


def _get_decoder_call(slab_rows_pad, tsr, steps, L, H, O, fold, out_dtype,
                      single_buffer_weights):
    """Build (and cache) the pallas_call for a given tiling / dtype config."""
    key = (slab_rows_pad, tsr, steps, L, H, O, fold,
           jnp.dtype(out_dtype).name, single_buffer_weights)
    fn = _CALL_CACHE.get(key)
    if fn is not None:
        return fn

    if single_buffer_weights:
        # Resident operands revisit the same block every step; double-buffering
        # them only wastes VMEM (matters most on v7x, 64 MiB / TC).
        w_kwargs = dict(pipeline_mode=pl.Buffered(1))
    else:
        w_kwargs = {}

    in_specs = [
        pl.BlockSpec((tsr, fold * L), lambda i: (i, 0)),               # x: tiled over batch
        pl.BlockSpec((fold * L, fold * H), lambda i: (0, 0), **w_kwargs),  # W1: resident
        pl.BlockSpec((1, fold * H), lambda i: (0, 0), **w_kwargs),         # b1: resident
        pl.BlockSpec((fold * H, fold * O), lambda i: (0, 0), **w_kwargs),  # W2: resident
        pl.BlockSpec((1, fold * O), lambda i: (0, 0), **w_kwargs),         # b2: resident
    ]
    fn = pl.pallas_call(
        _decoder_kernel,
        out_shape=jax.ShapeDtypeStruct((slab_rows_pad, fold * O), out_dtype),
        grid=(steps,),
        in_specs=in_specs,
        out_specs=pl.BlockSpec((tsr, fold * O), lambda i: (i, 0)),
        compiler_params=pltpu.CompilerParams(
            dimension_semantics=("parallel",),      # megacore sharding on v7x
            vmem_limit_bytes=32 * 1024 * 1024,      # explicit, generous headroom
        ),
    )
    _CALL_CACHE[key] = fn
    return fn


def fold_decoder_params(w1, b1, w2, b2, fold=_FOLD):
    """Precompute the folded (block-diagonal) decoder weights ONCE per param set.

    Weights are stored as [in, out] (transposed vs. torch).  The folded weights
    are bf16 (block-diagonal zeros stay exact; only the real weights lose
    mantissa bits), biases stay f32 for the in-kernel f32 bias/ReLU path.
    """
    L, H = w1.shape
    H2, O = w2.shape
    assert H2 == H, (w1.shape, w2.shape)
    eye = jnp.eye(fold, dtype=jnp.float32)
    w1_big = jnp.kron(eye, w1.astype(jnp.float32)).astype(jnp.bfloat16)   # [G*L, G*H]
    w2_big = jnp.kron(eye, w2.astype(jnp.float32)).astype(jnp.bfloat16)   # [G*H, G*O]
    b1_big = jnp.tile(b1.astype(jnp.float32), fold).reshape(1, fold * H)  # [1, G*H]
    b2_big = jnp.tile(b2.astype(jnp.float32), fold).reshape(1, fold * O)  # [1, G*O]
    return FoldedDecoderParams(fold, L, H, O, w1_big, b1_big, w2_big, b2_big)


def decoder_forward(latent_state, params: FoldedDecoderParams):
    """y = relu(x @ W1 + b1) @ W2 + b2, batch-gridded & lane-dense.

    latent_state: [B, L] (f32 or bf16); returns [B, O] in latent_state.dtype.
    `params` must come from fold_decoder_params (folded once per parameter set).
    """
    global _WEIGHTS_SINGLE_BUFFER

    B, L = latent_state.shape
    assert L == params.latent_dim, (L, params.latent_dim)
    fold, H, O = params.fold, params.hidden_size, params.obs_dim
    out_dtype = latent_state.dtype

    # ---- batch tiling: 64 rows -> one 128-lane-dense slab row ---------------
    slab_rows = pl.cdiv(B, fold)
    if slab_rows <= _MAX_TILE_SLAB_ROWS:
        # Single grid step: block == full array (valid tiling for any size).
        steps = 1
        tsr = slab_rows
    else:
        # Balance the grid: as few, as-even-as-possible steps so a batch just
        # past a tile boundary doesn't pad a whole wasted step and v7x's two
        # TensorCores get near-equal work.
        steps = pl.cdiv(slab_rows, _MAX_TILE_SLAB_ROWS)
        tsr = _round_up(pl.cdiv(slab_rows, steps), 8)

    slab_rows_pad = steps * tsr
    b_pad = slab_rows_pad * fold

    x = latent_state
    if b_pad != B:                                  # skip the pad copy when aligned
        x = jnp.pad(x, ((0, b_pad - B), (0, 0)))
    x_slab = x.reshape(slab_rows_pad, fold * L)     # free row-major reshape

    args = (x_slab, params.w1, params.b1, params.w2, params.b2)

    out_slab = None
    if _WEIGHTS_SINGLE_BUFFER:
        try:
            out_slab = _get_decoder_call(slab_rows_pad, tsr, steps, L, H, O,
                                         fold, out_dtype, True)(*args)
        except Exception:
            # This jax version rejects pl.Buffered(1) on top-level BlockSpecs;
            # fall back to default double-buffered weights (same results).
            _WEIGHTS_SINGLE_BUFFER = False
    if out_slab is None:
        out_slab = _get_decoder_call(slab_rows_pad, tsr, steps, L, H, O,
                                     fold, out_dtype, False)(*args)

    # Free reshape (row-major) back to [b_pad, O]; drop padding only if added.
    out = out_slab.reshape(b_pad, O)
    return out if b_pad == B else out[:B]


def init_decoder_params(key, latent_dim=4, obs_dim=2, hidden_size=20,
                        dtype=jnp.float32):
    """nn.Linear-style init: U(-1/sqrt(fan_in), +1/sqrt(fan_in)).

    Weights are stored as [in, out] (transposed relative to torch's [out, in]).
    """
    k1, k2, k3, k4 = jax.random.split(key, 4)
    bound1 = 1.0 / jnp.sqrt(latent_dim)
    bound2 = 1.0 / jnp.sqrt(hidden_size)
    w1 = jax.random.uniform(k1, (latent_dim, hidden_size), dtype,
                            minval=-bound1, maxval=bound1)
    b1 = jax.random.uniform(k2, (hidden_size,), dtype,
                            minval=-bound1, maxval=bound1)
    w2 = jax.random.uniform(k3, (hidden_size, obs_dim), dtype,
                            minval=-bound2, maxval=bound2)
    b2 = jax.random.uniform(k4, (obs_dim,), dtype,
                            minval=-bound2, maxval=bound2)
    return w1, b1, w2, b2


def decoder_reference(latent_state, w1, b1, w2, b2):
    """Pure-JAX f32 reference of the PyTorch forward pass."""
    h = jnp.maximum(latent_state @ w1 + b1, 0.0)
    return h @ w2 + b2


if __name__ == "__main__":
    latent_dim, obs_dim, hidden_size = 4, 2, 20

    key = jax.random.PRNGKey(0)
    kx, kp = jax.random.split(key)
    w1, b1, w2, b2 = init_decoder_params(kp, latent_dim, obs_dim, hidden_size)

    # Fold ONCE per parameter set (perf review: hoist kron out of the call path),
    # then reuse the folded params across every forward call below.
    folded = fold_decoder_params(w1, b1, w2, b2)

    # bf16-fed MXU -> relaxed tolerances vs the f32 reference (perf review note).
    TOL = dict(atol=5e-2, rtol=5e-2)

    # 1) Small batch (module-sized): single grid step, block == full array.
    x_small = jax.random.normal(kx, (8, latent_dim), jnp.float32)
    out_small = jax.block_until_ready(decoder_forward(x_small, folded))
    ref_small = decoder_reference(x_small, w1, b1, w2, b2)
    assert out_small.shape == (8, obs_dim), out_small.shape
    assert jnp.allclose(out_small, ref_small, **TOL), \
        "small-batch mismatch vs reference"

    # 2) Larger batch, still a single grid step (2500 rows -> 40 slab rows).
    x_mid = jax.random.normal(kx, (2500, latent_dim), jnp.float32)
    out_mid = jax.block_until_ready(decoder_forward(x_mid, folded))
    ref_mid = decoder_reference(x_mid, w1, b1, w2, b2)
    assert out_mid.shape == (2500, obs_dim), out_mid.shape
    assert jnp.allclose(out_mid, ref_mid, **TOL), \
        "single-step batch mismatch vs reference"

    # 3) Multi-step grid + padding path (4700 rows -> 74 slab rows -> 2x40 tiles).
    x_big = jax.random.normal(kx, (4700, latent_dim), jnp.float32)
    out_big = jax.block_until_ready(decoder_forward(x_big, folded))
    ref_big = decoder_reference(x_big, w1, b1, w2, b2)
    assert out_big.shape == (4700, obs_dim), out_big.shape
    assert jnp.allclose(out_big, ref_big, **TOL), \
        "gridded-batch mismatch vs reference"

    # 4) bf16 HBM boundary (halved I/O bytes), f32 accumulation inside the kernel.
    x_bf16 = x_mid.astype(jnp.bfloat16)
    out_bf16 = jax.block_until_ready(decoder_forward(x_bf16, folded))
    ref_bf16 = decoder_reference(x_bf16.astype(jnp.float32), w1, b1, w2, b2)
    assert out_bf16.dtype == jnp.bfloat16, out_bf16.dtype
    assert jnp.allclose(out_bf16.astype(jnp.float32), ref_bf16, **TOL), \
        "bf16 path mismatch vs reference"

    print("KERNEL_OK")
</pallas_src>

<mosaic_0001>
module attributes {stable_mosaic.version = 11 : i64} {
  func.func @_decoder_kernel(%arg0: i32, %arg1: memref<1x256xf32, #tpu.memory_space<vmem>>, %arg2: memref<256x1280xbf16, #tpu.memory_space<vmem>>, %arg3: memref<1x1280xf32, #tpu.memory_space<vmem>>, %arg4: memref<1280x128xbf16, #tpu.memory_space<vmem>>, %arg5: memref<1x128xf32, #tpu.memory_space<vmem>>, %arg6: memref<1x128xf32, #tpu.memory_space<vmem>>) attributes {dimension_semantics = [#tpu.dimension_semantics<parallel>], iteration_bounds = array<i64: 1>, scalar_prefetch = 0 : i64, scratch_operands = 0 : i64, tpu.core_type = #tpu.core_type<tc>, window_params = [{transform_indices = @transform_0, window_bounds = array<i64: 1, 256>}, {pipeline_mode = #tpu.pipeline_mode<synchronous>, transform_indices = @transform_1, window_bounds = array<i64: 256, 1280>}, {pipeline_mode = #tpu.pipeline_mode<synchronous>, transform_indices = @transform_2, window_bounds = array<i64: 1, 1280>}, {pipeline_mode = #tpu.pipeline_mode<synchronous>, transform_indices = @transform_3, window_bounds = array<i64: 1280, 128>}, {pipeline_mode = #tpu.pipeline_mode<synchronous>, transform_indices = @transform_4, window_bounds = array<i64: 1, 128>}, {transform_indices = @transform_5, window_bounds = array<i64: 1, 128>}]} {
    %c0 = arith.constant 0 : index
    %c0_0 = arith.constant 0 : index
    %0 = vector.load %arg1[%c0, %c0_0] : memref<1x256xf32, #tpu.memory_space<vmem>>, vector<1x256xf32>
    %1 = arith.truncf %0 : vector<1x256xf32> to vector<1x256xbf16>
    %c0_1 = arith.constant 0 : index
    %c0_2 = arith.constant 0 : index
    %2 = vector.load %arg2[%c0_1, %c0_2] : memref<256x1280xbf16, #tpu.memory_space<vmem>>, vector<256x1280xbf16>
    %cst = arith.constant dense<0.000000e+00> : vector<1x1280xf32>
    %3 = tpu.matmul %1, %2, %cst {dimension_numbers = #tpu.dot_dimension_numbers<[1], [0], [0], [1], [0, 0, 1, 1], [], []>} : vector<1x256xbf16>, vector<256x1280xbf16>, vector<1x1280xf32> -> vector<1x1280xf32>
    %c0_3 = arith.constant 0 : index
    %c0_4 = arith.constant 0 : index
    %4 = vector.load %arg3[%c0_3, %c0_4] : memref<1x1280xf32, #tpu.memory_space<vmem>>, vector<1x1280xf32>
    %5 = arith.addf %3, %4 : vector<1x1280xf32>
    %cst_5 = arith.constant 0.000000e+00 : f32
    %6 = vector.broadcast %cst_5 : f32 to vector<1x1280xf32>
    %7 = arith.maximumf %5, %6 : vector<1x1280xf32>
    %8 = arith.truncf %7 : vector<1x1280xf32> to vector<1x1280xbf16>
    %c0_6 = arith.constant 0 : index
    %c0_7 = arith.constant 0 : index
    %9 = vector.load %arg4[%c0_6, %c0_7] : memref<1280x128xbf16, #tpu.memory_space<vmem>>, vector<1280x128xbf16>
    %cst_8 = arith.constant dense<0.000000e+00> : vector<1x128xf32>
    %10 = tpu.matmul %8, %9, %cst_8 {dimension_numbers = #tpu.dot_dimension_numbers<[1], [0], [0], [1], [0, 0, 1, 1], [], []>} : vector<1x1280xbf16>, vector<1280x128xbf16>, vector<1x128xf32> -> vector<1x128xf32>
    %c0_9 = arith.constant 0 : index
    %c0_10 = arith.constant 0 : index
    %11 = vector.load %arg5[%c0_9, %c0_10] : memref<1x128xf32, #tpu.memory_space<vmem>>, vector<1x128xf32>
    %12 = arith.addf %10, %11 : vector<1x128xf32>
    %c0_11 = arith.constant 0 : index
    %c0_12 = arith.constant 0 : index
    %13 = vector.load %arg6[%c0_11, %c0_12] : memref<1x128xf32, #tpu.memory_space<vmem>>, vector<1x128xf32>
    tpu.vector_store %arg6[%c0_11, %c0_12], %12 {strides = array<i32>} : memref<1x128xf32, #tpu.memory_space<vmem>>, vector<1x128xf32>,
    return
  }
  func.func @transform_0(%arg0: i32) -> (i32, i32) {
    %c0_i32 = arith.constant 0 : i32
    %c0_i32_0 = arith.constant 0 : i32
    return %arg0, %c0_i32 : i32, i32
  }
  func.func @transform_1(%arg0: i32) -> (i32, i32) {
    %c0_i32 = arith.constant 0 : i32
    %c0_i32_0 = arith.constant 0 : i32
    %c0_i32_1 = arith.constant 0 : i32
    return %c0_i32, %c0_i32_0 : i32, i32
  }
  func.func @transform_2(%arg0: i32) -> (i32, i32) {
    %c0_i32 = arith.constant 0 : i32
    %c0_i32_0 = arith.constant 0 : i32
    %c0_i32_1 = arith.constant 0 : i32
    return %c0_i32, %c0_i32_0 : i32, i32
  }
  func.func @transform_3(%arg0: i32) -> (i32, i32) {
    %c0_i32 = arith.constant 0 : i32
    %c0_i32_0 = arith.constant 0 : i32
    %c0_i32_1 = arith.constant 0 : i32
    return %c0_i32, %c0_i32_0 : i32, i32
  }
  func.func @transform_4(%arg0: i32) -> (i32, i32) {
    %c0_i32 = arith.constant 0 : i32
    %c0_i32_0 = arith.constant 0 : i32
    %c0_i32_1 = arith.constant 0 : i32
    return %c0_i32, %c0_i32_0 : i32, i32
  }
  func.func @transform_5(%arg0: i32) -> (i32, i32) {
    %c0_i32 = arith.constant 0 : i32
    %c0_i32_0 = arith.constant 0 : i32
    return %arg0, %c0_i32 : i32, i32
  }
}

module attributes {stable_mosaic.version = 11 : i64} {
  func.func @_decoder_kernel(%arg0: i32, %arg1: memref<1x256xf32, #tpu.memory_space<vmem>>, %arg2: memref<256x1280xbf16, #tpu.memory_space<vmem>>, %arg3: memref<1x1280xf32, #tpu.memory_space<vmem>>, %arg4: memref<1280x128xbf16, #tpu.memory_space<vmem>>, %arg5: memref<1x128xf32, #tpu.memory_space<vmem>>, %arg6: memref<1x128xf32, #tpu.memory_space<vmem>>) attributes {dimension_semantics = [#tpu.dimension_semantics<parallel>], iteration_bounds = array<i64: 1>, scalar_prefetch = 0 : i64, scratch_operands = 0 : i64, tpu.core_type = #tpu.core_type<tc>, window_params = [{transform_indices = @transform_0, window_bounds = array<i64: 1, 256>}, {pipeline_mode = #tpu.pipeline_mode<synchronous>, transform_indices = @transform_1, window_bounds = array<i64: 256, 1280>}, {pipeline_mode = #tpu.pipeline_mode<synchronous>, transform_indices = @transform_2, window_bounds = array<i64: 1, 1280>}, {pipeline_mode = #tpu.pipeline_mode<synchronous>, transform_indices = @transform_3, window_bounds = array<i64: 1280, 128>}, {pipeline_mode = #tpu.pipeline_mode<synchronous>, transform_indices = @transform_4, window_bounds = array<i64: 1, 128>}, {transform_indices = @transform_5, window_bounds = array<i64: 1, 128>}]} {
    %c0 = arith.constant 0 : index
    %c0_0 = arith.constant 0 : index
    %0 = vector.load %arg1[%c0, %c0_0] : memref<1x256xf32, #tpu.memory_space<vmem>>, vector<1x256xf32>
    %1 = arith.truncf %0 : vector<1x256xf32> to vector<1x256xbf16>
    %c0_1 = arith.constant 0 : index
    %c0_2 = arith.constant 0 : index
    %2 = vector.load %arg2[%c0_1, %c0_2] : memref<256x1280xbf16, #tpu.memory_space<vmem>>, vector<256x1280xbf16>
    %cst = arith.constant dense<0.000000e+00> : vector<1x1280xf32>
    %3 = tpu.matmul %1, %2, %cst {dimension_numbers = #tpu.dot_dimension_numbers<[1], [0], [0], [1], [0, 0, 1, 1], [], []>} : vector<1x256xbf16>, vector<256x1280xbf16>, vector<1x1280xf32> -> vector<1x1280xf32>
    %c0_3 = arith.constant 0 : index
    %c0_4 = arith.constant 0 : index
    %4 = vector.load %arg3[%c0_3, %c0_4] : memref<1x1280xf32, #tpu.memory_space<vmem>>, vector<1x1280xf32>
    %5 = arith.addf %3, %4 : vector<1x1280xf32>
    %cst_5 = arith.constant 0.000000e+00 : f32
    %6 = vector.broadcast %cst_5 : f32 to vector<1x1280xf32>
    %7 = arith.maximumf %5, %6 : vector<1x1280xf32>
    %8 = arith.truncf %7 : vector<1x1280xf32> to vector<1x1280xbf16>
    %c0_6 = arith.constant 0 : index
    %c0_7 = arith.constant 0 : index
    %9 = vector.load %arg4[%c0_6, %c0_7] : memref<1280x128xbf16, #tpu.memory_space<vmem>>, vector<1280x128xbf16>
    %cst_8 = arith.constant dense<0.000000e+00> : vector<1x128xf32>
    %10 = tpu.matmul %8, %9, %cst_8 {dimension_numbers = #tpu.dot_dimension_numbers<[1], [0], [0], [1], [0, 0, 1, 1], [], []>} : vector<1x1280xbf16>, vector<1280x128xbf16>, vector<1x128xf32> -> vector<1x128xf32>
    %c0_9 = arith.constant 0 : index
    %c0_10 = arith.constant 0 : index
    %11 = vector.load %arg5[%c0_9, %c0_10] : memref<1x128xf32, #tpu.memory_space<vmem>>, vector<1x128xf32>
    %12 = arith.addf %10, %11 : vector<1x128xf32>
    %c0_11 = arith.constant 0 : index
    %c0_12 = arith.constant 0 : index
    %13 = vector.load %arg6[%c0_11, %c0_12] : memref<1x128xf32, #tpu.memory_space<vmem>>, vector<1x128xf32>
    tpu.vector_store %arg6[%c0_11, %c0_12], %12 {strides = array<i32>} : memref<1x128xf32, #tpu.memory_space<vmem>>, vector<1x128xf32>,
    return
  }
  func.func @transform_0(%arg0: i32) -> (i32, i32) {
    %c0_i32 = arith.constant 0 : i32
    %c0_i32_0 = arith.constant 0 : i32
    return %arg0, %c0_i32 : i32, i32
  }
  func.func @transform_1(%arg0: i32) -> (i32, i32) {
    %c0_i32 = arith.constant 0 : i32
    %c0_i32_0 = arith.constant 0 : i32
    %c0_i32_1 = arith.constant 0 : i32
    return %c0_i32, %c0_i32_0 : i32, i32
  }
  func.func @transform_2(%arg0: i32) -> (i32, i32) {
    %c0_i32 = arith.constant 0 : i32
    %c0_i32_0 = arith.constant 0 : i32
    %c0_i32_1 = arith.constant 0 : i32
    return %c0_i32, %c0_i32_0 : i32, i32
  }
  func.func @transform_3(%arg0: i32) -> (i32, i32) {
    %c0_i32 = arith.constant 0 : i32
    %c0_i32_0 = arith.constant 0 : i32
    %c0_i32_1 = arith.constant 0 : i32
    return %c0_i32, %c0_i32_0 : i32, i32
  }
  func.func @transform_4(%arg0: i32) -> (i32, i32) {
    %c0_i32 = arith.constant 0 : i32
    %c0_i32_0 = arith.constant 0 : i32
    %c0_i32_1 = arith.constant 0 : i32
    return %c0_i32, %c0_i32_0 : i32, i32
  }
  func.func @transform_5(%arg0: i32) -> (i32, i32) {
    %c0_i32 = arith.constant 0 : i32
    %c0_i32_0 = arith.constant 0 : i32
    return %arg0, %c0_i32 : i32, i32
  }
}

</mosaic_0001>

<bundles_post_ra>
// kernel: tpu_custom_call.1
= control target key start
LH: loop header
LB: loop body
LE: loop exit
PB: predicated region body
PF: predicated region fallthrough
CT: control target
= control target key end

     0   :  { %10 = vsyncpa [#allocation3], 0  ;;  %s3128_s0 = inlined_call_operand.hbm [shape: f32[1,256], index: 0, kind: input, shape index: {}]   ;;  %s3129_s1 = inlined_call_operand.hbm [shape: bf16[256,1280], index: 1, kind: input, shape index: {}]   ;;  %s3130_s2 = inlined_call_operand.hbm [shape: f32[1,1280], index: 2, kind: input, shape index: {}]   ;;  %s3131_s3 = inlined_call_operand.hbm [shape: bf16[1280,128], index: 3, kind: input, shape index: {}]   ;;  %s3132_s4 = inlined_call_operand.vmem [shape: f32[1,128], index: 4, kind: input, shape index: {}]   ;;  %s3133_s5 = inlined_call_operand.hbm [shape: f32[1,128], index: 5, kind: output, shape index: {}]  }
   0x1   :  { %11 = vsyncpa [#allocation6], 0 }
   0x2   :  { %12 = vsyncpa [#allocation9], 0 }
   0x3   :  { %13 = vsyncpa [#allocation4], 0  ;;  %s2982_s18 = smov [#allocation5]   ;;  %s2864_s22 = scalar_lea.hbm %s3129_s1, 20480 }
   0x4   :  { %s29_s19 = sshll.u32 %s2982_s18, 4  ;;  %p2865_p0 = scmp.ne.s32.totalorder %s3129_s1, %s2864_s22  ;;  %s30_s19 = int_to_ptr.vmem [resolvable:$true] %s29_s19 }
   0x5   :  { %p2868_p1 = scmp.lt.u32.totalorder %s2864_s22, %s3129_s1 }
   0x7   :  { %p2870_p2 = pnand %p2868_p1, %p2865_p0 }
   0x9   :  { %2873 = shalt.err (!%p2870_p2)
}
   0xa   :  { %s2874_s27 = scalar_lea.vmem %s30_s19, 20480  ;;  %p2879_p4 = scmp.lt.s32.totalorder %s30_s19, %s30_s19 }
   0xb   :  { %p2875_p3 = scmp.ne.s32.totalorder %s30_s19, %s2874_s27  ;;  %p2880_p5 = scmp.lt.s32.totalorder %s2874_s27, %s2874_s27 }
   0xd   :  { %p2881_p6 = por %p2880_p5, %p2879_p4 }
   0xf   :  { %p2882_p7 = pnand %p2881_p6, %p2875_p3 }
  0x11   :  { %2885 = shalt.err (!%p2882_p7)
}
  0x12   :  { %s2983_s28 = smov 640   ;;  %s2984_s29 = smov 40  }
  0x13   :  { %35 = dma.hbm_to_vmem [thread:$0]  %s3129_s1, 20480, %s30_s19, [#allocation6], %s2983_s28, %s2983_s28, %s2984_s29  }
  0x14   :  { %s2985_s7 = smov [#allocation2]   ;;  %s2986_s9 = smov [#allocation7]  }
  0x15   :  { %s20_s8 = sshll.u32 %s2985_s7, 4  ;;  %s42_s10 = sshll.u32 %s2986_s9, 4  ;;  %s21_s8 = int_to_ptr.vmem [resolvable:$true] %s20_s8  ;;  %s43_s10 = int_to_ptr.vmem [resolvable:$true] %s42_s10 }
  0x16   :  { %s2886_s13 = scalar_lea.hbm %s3128_s0, 32 }
  0x17   :  { %p2887_p8 = scmp.ne.s32.totalorder %s3128_s0, %s2886_s13  ;;  %p2890_p9 = scmp.lt.u32.totalorder %s2886_s13, %s3128_s0 }
  0x19   :  { %p2892_p10 = pnand %p2890_p9, %p2887_p8 }
  0x1b   :  { %2895 = shalt.err (!%p2892_p10)
}
  0x1c   :  { %s2896_s1 = scalar_lea.vmem %s21_s8, 32  ;;  %p2901_p12 = scmp.lt.s32.totalorder %s21_s8, %s21_s8 }
  0x1d   :  { %p2897_p11 = scmp.ne.s32.totalorder %s21_s8, %s2896_s1  ;;  %p2902_p13 = scmp.lt.s32.totalorder %s2896_s1, %s2896_s1 }
  0x1f   :  { %p2903_p0 = por %p2902_p13, %p2901_p12 }
  0x21   :  { %p2904_p1 = pnand %p2903_p0, %p2897_p11 }
  0x23   :  { %2907 = shalt.err (!%p2904_p1)
}
  0x24   :  { %23 = dma.hbm_to_vmem [thread:$0]  %s3128_s0, 32, %s21_s8, [#allocation3]  }
  0x25   :  { %s2908_s22 = scalar_lea.hbm %s3130_s2, 160 }
  0x26   :  { %p2909_p2 = scmp.ne.s32.totalorder %s3130_s2, %s2908_s22  ;;  %p2912_p3 = scmp.lt.u32.totalorder %s2908_s22, %s3130_s2 }
  0x28   :  { %p2914_p4 = pnand %p2912_p3, %p2909_p2 }
  0x2a   :  { %2917 = shalt.err (!%p2914_p4)
}
  0x2b   :  { %s2918_s27 = scalar_lea.vmem %s43_s10, 160  ;;  %p2923_p6 = scmp.lt.s32.totalorder %s43_s10, %s43_s10 }
  0x2c   :  { %p2919_p5 = scmp.ne.s32.totalorder %s43_s10, %s2918_s27  ;;  %p2924_p7 = scmp.lt.s32.totalorder %s2918_s27, %s2918_s27 }
  0x2e   :  { %p2925_p8 = por %p2924_p7, %p2923_p6 }
  0x30   :  { %p2926_p9 = pnand %p2925_p8, %p2919_p5 }
  0x32   :  { %2929 = shalt.err (!%p2926_p9)
}
  0x33   :  { %45 = dma.hbm_to_vmem [thread:$0]  %s3130_s2, 160, %s43_s10, [#allocation6]  }
  0x34   :  { %s2987_s29 = smov [#allocation8]   ;;  %s2930_s8 = scalar_lea.hbm %s3131_s3, 10240 }
  0x35   :  { %s51_s30 = sshll.u32 %s2987_s29, 4  ;;  %p2931_p10 = scmp.ne.s32.totalorder %s3131_s3, %s2930_s8  ;;  %s52_s30 = int_to_ptr.vmem [resolvable:$true] %s51_s30 }
  0x36   :  { %p2934_p11 = scmp.lt.u32.totalorder %s2930_s8, %s3131_s3 }
  0x38   :  { %p2936_p12 = pnand %p2934_p11, %p2931_p10 }
  0x3a   :  { %2939 = shalt.err (!%p2936_p12)
}
  0x3b   :  { %s2940_s14 = scalar_lea.vmem %s52_s30, 10240  ;;  %p2945_p0 = scmp.lt.s32.totalorder %s52_s30, %s52_s30 }
  0x3c   :  { %p2941_p13 = scmp.ne.s32.totalorder %s52_s30, %s2940_s14  ;;  %p2946_p1 = scmp.lt.s32.totalorder %s2940_s14, %s2940_s14 }
  0x3e   :  { %p2947_p2 = por %p2946_p1, %p2945_p0 }
  0x40   :  { %p2948_p3 = pnand %p2947_p2, %p2941_p13 }
  0x42   :  { %2951 = shalt.err (!%p2948_p3)
}
  0x43   :  { %s2988_s2 = smov 64   ;;  %s2989_s10 = smov 4  }
  0x44   :  { %57 = dma.hbm_to_vmem [thread:$0]  %s3131_s3, 10240, %s52_s30, [#allocation9], %s2988_s2, %s2988_s2, %s2989_s10  }
  0x45   :  { %2974 = dma.done.wait [#allocation3], 32  }
  0x46   :  { %2975 = vsyncadd [#allocation3], 4294967264 }
  0x47   :  { %2976 = dma.done.wait [#allocation6], 20640  }
  0x48   :  { %2977 = vsyncadd [#allocation6], 4294946656 }
  0x49   :  { %2978 = dma.done.wait [#allocation9], 10240  }
  0x4a   :  { %2979 = vsyncadd [#allocation9], 4294957056  ;;  %v2544_v0 = vld [vmem:[#allocation5 + $0x4] ss:$40 sps:$4 sm:$0xff]   ;;  %v2546_v1 = vld [vmem:[#allocation5] ss:$40 sps:$4 sm:$0xff]   ;;  %v75_v35 = vlaneseq }
  0x4b   :  { %1101 = vmatprep.subr.bf16.mxu0 %v2544_v0  ;;  %v2547_v2 = vld [vmem:[#allocation5 + $0xc] ss:$40 sps:$4 sm:$0xff]   ;;  %v2549_v3 = vld [vmem:[#allocation5 + $0x8] ss:$40 sps:$4 sm:$0xff]   ;;  %v2553_v6 = vld [vmem:[#allocation5 + $0x5c] ss:$40 sps:$4 sm:$0xff]  }
  0x4c   :  { %1102 = vmatpush1.bf16.msra.mxu0 %v2546_v1  ;;  %v2550_v4 = vld [vmem:[#allocation5 + $0x54] ss:$40 sps:$4 sm:$0xff]   ;;  %v2552_v5 = vld [vmem:[#allocation5 + $0x50] ss:$40 sps:$4 sm:$0xff]   ;;  %1142 = vmatprep.subr.bf16.mxu1 %v2547_v2  ;;  %v2556_v8 = vld [vmem:[#allocation5 + $0xa4] ss:$40 sps:$4 sm:$0xff]  }
  0x4d   :  { %1143 = vmatpush1.bf16.msra.mxu1 %v2549_v3  ;;  %1103 = vmatprep.subr.bf16.mxu0 %v2550_v4  ;;  %v2555_v7 = vld [vmem:[#allocation5 + $0x58] ss:$40 sps:$4 sm:$0xff]   ;;  %v2559_v10 = vld [vmem:[#allocation5 + $0xac] ss:$40 sps:$4 sm:$0xff]   ;;  %v2561_v12 = vld [vmem:[#allocation5 + $0xa8] ss:$40 sps:$4 sm:$0xff]  }
  0x4e   :  { %1144 = vmatprep.subr.bf16.mxu1 %v2553_v6  ;;  %v2558_v9 = vld [vmem:[#allocation5 + $0xa0] ss:$40 sps:$4 sm:$0xff]   ;;  %v2562_v11 = vld [vmem:[#allocation5 + $0xf4] ss:$40 sps:$4 sm:$0xff]   ;;  %v2564_v14 = vld [vmem:[#allocation5 + $0xf0] ss:$40 sps:$4 sm:$0xff]  }
  0x4f   :  { %v2565_v13 = vld [vmem:[#allocation5 + $0xfc] ss:$40 sps:$4 sm:$0xff]   ;;  %v2567_v16 = vld [vmem:[#allocation5 + $0xf8] ss:$40 sps:$4 sm:$0xff]   ;;  %v2571_v17 = vld [vmem:[#allocation5 + $0x14c] ss:$40 sps:$4 sm:$0xff]  }
  0x50   :  { %1104 = vmatpush1.bf16.msra.mxu0 %v2552_v5  ;;  %v2568_v15 = vld [vmem:[#allocation5 + $0x144] ss:$40 sps:$4 sm:$0xff]   ;;  %v2570_v18 = vld [vmem:[#allocation5 + $0x140] ss:$40 sps:$4 sm:$0xff]   ;;  %v2574_v19 = vld [vmem:[#allocation5 + $0x194] ss:$40 sps:$4 sm:$0xff]  }
  0x51   :  { %1105 = vmatprep.subr.bf16.mxu0 %v2556_v8  ;;  %1145 = vmatpush1.bf16.msra.mxu1 %v2555_v7  ;;  %v2573_v20 = vld [vmem:[#allocation5 + $0x148] ss:$40 sps:$4 sm:$0xff]   ;;  %v2577_v21 = vld [vmem:[#allocation5 + $0x19c] ss:$40 sps:$4 sm:$0xff]   ;;  %v2579_v24 = vld [vmem:[#allocation5 + $0x198] ss:$40 sps:$4 sm:$0xff]  }
  0x52   :  { %1146 = vmatprep.subr.bf16.mxu1 %v2559_v10  ;;  %v2576_v22 = vld [vmem:[#allocation5 + $0x190] ss:$40 sps:$4 sm:$0xff]   ;;  %v2580_v23 = vld [vmem:[#allocation5 + $0x1e4] ss:$40 sps:$4 sm:$0xff]   ;;  %v2582_v26 = vld [vmem:[#allocation5 + $0x1e0] ss:$40 sps:$4 sm:$0xff]  }
  0x53   :  { %v2583_v25 = vld [vmem:[#allocation5 + $0x1ec] ss:$40 sps:$4 sm:$0xff]   ;;  %v2585_v28 = vld [vmem:[#allocation5 + $0x1e8] ss:$40 sps:$4 sm:$0xff]   ;;  %v2589_v29 = vld [vmem:[#allocation5 + $0x23c] ss:$40 sps:$4 sm:$0xff]  }
  0x54   :  { %1106 = vmatpush1.bf16.msra.mxu0 %v2558_v9  ;;  %v2586_v27 = vld [vmem:[#allocation5 + $0x234] ss:$40 sps:$4 sm:$0xff]   ;;  %v2588_v30 = vld [vmem:[#allocation5 + $0x230] ss:$40 sps:$4 sm:$0xff]   ;;  %v2592_v31 = vld [vmem:[#allocation5 + $0x284] ss:$40 sps:$4 sm:$0xff]  }
  0x55   :  { %1107 = vmatprep.subr.bf16.mxu0 %v2562_v11  ;;  %1147 = vmatpush1.bf16.msra.mxu1 %v2561_v12  ;;  %v2591_v32 = vld [vmem:[#allocation5 + $0x238] ss:$40 sps:$4 sm:$0xff]   ;;  %v2595_v33 = vld [vmem:[#allocation5 + $0x28c] ss:$40 sps:$4 sm:$0xff]   ;;  %v2597_v37 = vld [vmem:[#allocation5 + $0x288] ss:$40 sps:$4 sm:$0xff]  }
  0x56   :  { %1148 = vmatprep.subr.bf16.mxu1 %v2565_v13  ;;  %v2594_v34 = vld [vmem:[#allocation5 + $0x280] ss:$40 sps:$4 sm:$0xff]   ;;  %v2598_v36 = vld [vmem:[#allocation5 + $0x2d4] ss:$40 sps:$4 sm:$0xff]   ;;  %v2600_v39 = vld [vmem:[#allocation5 + $0x2d0] ss:$40 sps:$4 sm:$0xff]  }
  0x57   :  { %v2601_v38 = vld [vmem:[#allocation5 + $0x2dc] ss:$40 sps:$4 sm:$0xff]   ;;  %v3069_v40 = vshrl.u32 %v75_v35, 7  ;;  %v2603_v42 = vld [vmem:[#allocation5 + $0x2d8] ss:$40 sps:$4 sm:$0xff]  }
  0x58   :  { %1108 = vmatpush1.bf16.msra.mxu0 %v2564_v14  ;;  %v2604_v41 = vld [vmem:[#allocation5 + $0x324] ss:$40 sps:$4 sm:$0xff]   ;;  %v2606_v44 = vld [vmem:[#allocation5 + $0x320] ss:$40 sps:$4 sm:$0xff]   ;;  %v2610_v46 = vld [vmem:[#allocation5 + $0x374] ss:$40 sps:$4 sm:$0xff]  }
  0x59   :  { %1109 = vmatprep.subr.bf16.mxu0 %v2568_v15  ;;  %1149 = vmatpush1.bf16.msra.mxu1 %v2567_v16  ;;  %v2607_v43 = vld [vmem:[#allocation5 + $0x32c] ss:$40 sps:$4 sm:$0xff]   ;;  %v3072_v45 = vsub.s32 1, %v3069_v40  ;;  %v2609_v47 = vld [vmem:[#allocation5 + $0x328] ss:$40 sps:$4 sm:$0xff]   ;;  %v3080_v0 = vsub.s32 0, %v3069_v40 }
  0x5a   :  { %1150 = vmatprep.subr.bf16.mxu1 %v2571_v17  ;;  %v2613_v48 = vld [vmem:[#allocation5 + $0x37c] ss:$40 sps:$4 sm:$0xff]   ;;  %v2612_v50 = vld [vmem:[#allocation5 + $0x370] ss:$40 sps:$4 sm:$0xff]   ;;  %v2619_v55 = vld [vmem:[#allocation5 + $0x3cc] ss:$40 sps:$4 sm:$0xff]  }
  0x5b   :  { %v73_v49 = vld [vmem:[#allocation2] sm:$0x3]  ;;  %v2616_v52 = vld [vmem:[#allocation5 + $0x3c4] ss:$40 sps:$4 sm:$0xff]   ;;  %v2615_v53 = vld [vmem:[#allocation5 + $0x378] ss:$40 sps:$4 sm:$0xff]  }
  0x5c   :  { %1110 = vmatpush1.bf16.msra.mxu0 %v2570_v18  ;;  %v82_v51 = vrot.slane %v73_v49, %v3072_v45  ;;  %v2618_v56 = vld [vmem:[#allocation5 + $0x3c0] ss:$40 sps:$4 sm:$0xff]   ;;  %v2622_v57 = vld [vmem:[#allocation5 + $0x414] ss:$40 sps:$4 sm:$0xff]   ;;  %v2624_v60 = vld [vmem:[#allocation5 + $0x410] ss:$40 sps:$4 sm:$0xff]   ;;  %v78_v5 = vrot.slane %v73_v49, %v3080_v0 }
  0x5d   :  { %1111 = vmatprep.subr.bf16.mxu0 %v2574_v19  ;;  %1151 = vmatpush1.bf16.msra.mxu1 %v2573_v20  ;;  %v2621_v58 = vld [vmem:[#allocation5 + $0x3c8] ss:$40 sps:$4 sm:$0xff]   ;;  %v2625_v59 = vld [vmem:[#allocation5 + $0x41c] ss:$40 sps:$4 sm:$0xff]   ;;  %v2627_v62 = vld [vmem:[#allocation5 + $0x418] ss:$40 sps:$4 sm:$0xff]  }
  0x5e   :  { %1152 = vmatprep.subr.bf16.mxu1 %v2577_v21  ;;  %v3075_v54 = vpack.c.bf16 %v82_v51, %v82_v51  ;;  %v2628_v61 = vld [vmem:[#allocation5 + $0x464] ss:$40 sps:$4 sm:$0xff]   ;;  %v2630_v1 = vld [vmem:[#allocation5 + $0x460] ss:$40 sps:$4 sm:$0xff]   ;;  %v2634_v2 = vld [vmem:[#allocation5 + $0x4b4] ss:$40 sps:$4 sm:$0xff]   ;;  %v3083_v9 = vpack.c.bf16 %v78_v5, %v78_v5 }
  0x5f   :  { %v2631_v63 = vld [vmem:[#allocation5 + $0x46c] ss:$40 sps:$4 sm:$0xff]   ;;  %v2633_v3 = vld [vmem:[#allocation5 + $0x468] ss:$40 sps:$4 sm:$0xff]   ;;  %v2637_v4 = vld [vmem:[#allocation5 + $0x4bc] ss:$40 sps:$4 sm:$0xff]  }
  0x60   :  { %1112 = vmatpush1.bf16.msra.mxu0 %v2576_v22  ;;  %1133 = vmatprep.mubr.bf16.mxu0 %v3075_v54  ;;  %v2636_v6 = vld [vmem:[#allocation5 + $0x4b0] ss:$40 sps:$4 sm:$0xff]   ;;  %v2642_v7 = vld [vmem:[#allocation5 + $0x14] ss:$40 sps:$4 sm:$0xff]   ;;  %v2648_v12 = vld [vmem:[#allocation5 + $0x64] ss:$40 sps:$4 sm:$0xff]  }
  0x61   :  { %1113 = vmatprep.subr.bf16.mxu0 %v2580_v23  ;;  %1153 = vmatpush1.bf16.msra.mxu1 %v2579_v24  ;;  %v2639_v8 = vld [vmem:[#allocation5 + $0x4b8] ss:$40 sps:$4 sm:$0xff]   ;;  %v2645_v10 = vld [vmem:[#allocation5 + $0x1c] ss:$40 sps:$4 sm:$0xff]   ;;  %v2651_v14 = vld [vmem:[#allocation5 + $0x6c] ss:$40 sps:$4 sm:$0xff]  }
  0x62   :  { %1154 = vmatprep.subr.bf16.mxu1 %v2583_v25  ;;  %1174 = vmatprep.mubr.bf16.mxu1 %v3075_v54  ;;  %v2640_v11 = vld [vmem:[#allocation5 + $0x10] ss:$40 sps:$4 sm:$0xff]   ;;  %v2646_v15 = vld [vmem:[#allocation5 + $0x60] ss:$40 sps:$4 sm:$0xff]   ;;  %v2654_v16 = vld [vmem:[#allocation5 + $0xb4] ss:$40 sps:$4 sm:$0xff]  }
  0x63   :  { %v2643_v13 = vld [vmem:[#allocation5 + $0x18] ss:$40 sps:$4 sm:$0xff]   ;;  %v2649_v17 = vld [vmem:[#allocation5 + $0x68] ss:$40 sps:$4 sm:$0xff]   ;;  %v2657_v18 = vld [vmem:[#allocation5 + $0xbc] ss:$40 sps:$4 sm:$0xff]  }
  0x64   :  { %1114 = vmatpush1.bf16.msra.mxu0 %v2582_v26  ;;  %v2652_v19 = vld [vmem:[#allocation5 + $0xb0] ss:$40 sps:$4 sm:$0xff]   ;;  %v2660_v20 = vld [vmem:[#allocation5 + $0x104] ss:$40 sps:$4 sm:$0xff]   ;;  %v2658_v23 = vld [vmem:[#allocation5 + $0x100] ss:$40 sps:$4 sm:$0xff]  }
  0x65   :  { %1115 = vmatprep.subr.bf16.mxu0 %v2586_v27  ;;  %1155 = vmatpush1.bf16.msra.mxu1 %v2585_v28  ;;  %v2655_v21 = vld [vmem:[#allocation5 + $0xb8] ss:$40 sps:$4 sm:$0xff]   ;;  %v2663_v22 = vld [vmem:[#allocation5 + $0x10c] ss:$40 sps:$4 sm:$0xff]   ;;  %v2661_v25 = vld [vmem:[#allocation5 + $0x108] ss:$40 sps:$4 sm:$0xff]  }
  0x66   :  { %1156 = vmatprep.subr.bf16.mxu1 %v2589_v29  ;;  %v2666_v24 = vld [vmem:[#allocation5 + $0x154] ss:$40 sps:$4 sm:$0xff]   ;;  %v2664_v27 = vld [vmem:[#allocation5 + $0x150] ss:$40 sps:$4 sm:$0xff]   ;;  %v2672_v28 = vld [vmem:[#allocation5 + $0x1a4] ss:$40 sps:$4 sm:$0xff]  }
  0x67   :  { %v2669_v26 = vld [vmem:[#allocation5 + $0x15c] ss:$40 sps:$4 sm:$0xff]   ;;  %v2667_v29 = vld [vmem:[#allocation5 + $0x158] ss:$40 sps:$4 sm:$0xff]   ;;  %v2697_v51 = vld [vmem:[#allocation5 + $0x2e8] ss:$40 sps:$4 sm:$0xff]  }
  0x68   :  { %1116 = vmatpush1.bf16.msra.mxu0 %v2588_v30  ;;  %v2675_v30 = vld [vmem:[#allocation5 + $0x1ac] ss:$40 sps:$4 sm:$0xff]   ;;  %v2676_v35 = vld [vmem:[#allocation5 + $0x1f0] ss:$40 sps:$4 sm:$0xff]   ;;  %v2694_v49 = vld [vmem:[#allocation5 + $0x2e0] ss:$40 sps:$4 sm:$0xff]  }
  0x69   :  { %1117 = vmatprep.subr.bf16.mxu0 %v2592_v31  ;;  %1157 = vmatpush1.bf16.msra.mxu1 %v2591_v32  ;;  %v2670_v31 = vld [vmem:[#allocation5 + $0x1a0] ss:$40 sps:$4 sm:$0xff]   ;;  %v2678_v32 = vld [vmem:[#allocation5 + $0x1f4] ss:$40 sps:$4 sm:$0xff]  }
  0x6a   :  { %1158 = vmatprep.subr.bf16.mxu1 %v2595_v33  ;;  %v2673_v33 = vld [vmem:[#allocation5 + $0x1a8] ss:$40 sps:$4 sm:$0xff]   ;;  %v2726_v5 = vld [vmem:[#allocation5 + $0x474] ss:$40 sps:$4 sm:$0xff]  }
  0x6c   :  { %1118 = vmatpush1.bf16.msra.mxu0 %v2594_v34  ;;  %v2681_v34 = vld [vmem:[#allocation5 + $0x1fc] ss:$40 sps:$4 sm:$0xff]  }
  0x6d   :  { %1119 = vmatprep.subr.bf16.mxu0 %v2598_v36  ;;  %1159 = vmatpush1.bf16.msra.mxu1 %v2597_v37  ;;  %v2684_v36 = vld [vmem:[#allocation5 + $0x244] ss:$40 sps:$4 sm:$0xff]   ;;  %v2679_v37 = vld [vmem:[#allocation5 + $0x1f8] ss:$40 sps:$4 sm:$0xff]  }
  0x6e   :  { %1160 = vmatprep.subr.bf16.mxu1 %v2601_v38  ;;  %v2687_v38 = vld [vmem:[#allocation5 + $0x24c] ss:$40 sps:$4 sm:$0xff]  }
  0x70   :  { %1120 = vmatpush1.bf16.msra.mxu0 %v2600_v39  ;;  %v2682_v39 = vld [vmem:[#allocation5 + $0x240] ss:$40 sps:$4 sm:$0xff]  }
  0x71   :  { %1121 = vmatprep.subr.bf16.mxu0 %v2604_v41  ;;  %1161 = vmatpush1.bf16.msra.mxu1 %v2603_v42  ;;  %v2690_v41 = vld [vmem:[#allocation5 + $0x294] ss:$40 sps:$4 sm:$0xff]   ;;  %v2685_v42 = vld [vmem:[#allocation5 + $0x248] ss:$40 sps:$4 sm:$0xff]  }
  0x72   :  { %1162 = vmatprep.subr.bf16.mxu1 %v2607_v43  ;;  %v2693_v43 = vld [vmem:[#allocation5 + $0x29c] ss:$40 sps:$4 sm:$0xff]  }
  0x74   :  { %1122 = vmatpush1.bf16.msra.mxu0 %v2606_v44  ;;  %v2688_v44 = vld [vmem:[#allocation5 + $0x290] ss:$40 sps:$4 sm:$0xff]  }
  0x75   :  { %1123 = vmatprep.subr.bf16.mxu0 %v2610_v46  ;;  %1163 = vmatpush1.bf16.msra.mxu1 %v2609_v47  ;;  %v2696_v46 = vld [vmem:[#allocation5 + $0x2e4] ss:$40 sps:$4 sm:$0xff]   ;;  %v2691_v47 = vld [vmem:[#allocation5 + $0x298] ss:$40 sps:$4 sm:$0xff]  }
  0x76   :  { %1164 = vmatprep.subr.bf16.mxu1 %v2613_v48  ;;  %v2699_v48 = vld [vmem:[#allocation5 + $0x2ec] ss:$40 sps:$4 sm:$0xff]  }
  0x78   :  { %1124 = vmatpush1.bf16.msra.mxu0 %v2612_v50  ;;  %v2702_v50 = vld [vmem:[#allocation5 + $0x334] ss:$40 sps:$4 sm:$0xff]  }
  0x79   :  { %1125 = vmatprep.subr.bf16.mxu0 %v2616_v52  ;;  %1165 = vmatpush1.bf16.msra.mxu1 %v2615_v53  ;;  %v2705_v52 = vld [vmem:[#allocation5 + $0x33c] ss:$40 sps:$4 sm:$0xff]   ;;  %v2700_v53 = vld [vmem:[#allocation5 + $0x330] ss:$40 sps:$4 sm:$0xff]  }
  0x7a   :  { %1166 = vmatprep.subr.bf16.mxu1 %v2619_v55  ;;  %v2708_v55 = vld [vmem:[#allocation5 + $0x384] ss:$40 sps:$4 sm:$0xff]  }
  0x7c   :  { %1126 = vmatpush1.bf16.msra.mxu0 %v2618_v56  ;;  %v2703_v56 = vld [vmem:[#allocation5 + $0x338] ss:$40 sps:$4 sm:$0xff]  }
  0x7d   :  { %1127 = vmatprep.subr.bf16.mxu0 %v2622_v57  ;;  %1167 = vmatpush1.bf16.msra.mxu1 %v2621_v58  ;;  %v2706_v57 = vld [vmem:[#allocation5 + $0x380] ss:$40 sps:$4 sm:$0xff]   ;;  %v2711_v58 = vld [vmem:[#allocation5 + $0x38c] ss:$40 sps:$4 sm:$0xff]  }
  0x7e   :  { %1168 = vmatprep.subr.bf16.mxu1 %v2625_v59  ;;  %v2709_v59 = vld [vmem:[#allocation5 + $0x388] ss:$40 sps:$4 sm:$0xff]  }
  0x80   :  { %1128 = vmatpush1.bf16.msra.mxu0 %v2624_v60  ;;  %v2714_v60 = vld [vmem:[#allocation5 + $0x3d4] ss:$40 sps:$4 sm:$0xff]  }
  0x81   :  { %1129 = vmatprep.subr.bf16.mxu0 %v2628_v61  ;;  %1169 = vmatpush1.bf16.msra.mxu1 %v2627_v62  ;;  %v2712_v61 = vld [vmem:[#allocation5 + $0x3d0] ss:$40 sps:$4 sm:$0xff]   ;;  %v2717_v62 = vld [vmem:[#allocation5 + $0x3dc] ss:$40 sps:$4 sm:$0xff]  }
  0x82   :  { %1170 = vmatprep.subr.bf16.mxu1 %v2631_v63  ;;  %v2715_v63 = vld [vmem:[#allocation5 + $0x3d8] ss:$40 sps:$4 sm:$0xff]  }
  0x84   :  { %1130 = vmatpush1.bf16.msra.mxu0 %v2630_v1  ;;  %v2720_v1 = vld [vmem:[#allocation5 + $0x424] ss:$40 sps:$4 sm:$0xff]  }
  0x85   :  { %1131 = vmatprep.subr.bf16.mxu0 %v2634_v2  ;;  %1171 = vmatpush1.bf16.msra.mxu1 %v2633_v3  ;;  %v2718_v2 = vld [vmem:[#allocation5 + $0x420] ss:$40 sps:$4 sm:$0xff]   ;;  %v2723_v3 = vld [vmem:[#allocation5 + $0x42c] ss:$40 sps:$4 sm:$0xff]  }
  0x86   :  { %1172 = vmatprep.subr.bf16.mxu1 %v2637_v4  ;;  %v2721_v4 = vld [vmem:[#allocation5 + $0x428] ss:$40 sps:$4 sm:$0xff]  }
  0x88   :  { %1132 = vmatpush1.bf16.msra.mxu0 %v2636_v6  ;;  %v2724_v6 = vld [vmem:[#allocation5 + $0x470] ss:$40 sps:$4 sm:$0xff]  }
  0x89   :  { %1183 = vmatprep.subr.bf16.mxu0 %v2642_v7  ;;  %1173 = vmatpush1.bf16.msra.mxu1 %v2639_v8  ;;  %v2729_v7 = vld [vmem:[#allocation5 + $0x47c] ss:$40 sps:$4 sm:$0xff]   ;;  %v2727_v8 = vld [vmem:[#allocation5 + $0x478] ss:$40 sps:$4 sm:$0xff]  }
  0x8a   :  { %1224 = vmatprep.subr.bf16.mxu1 %v2645_v10  ;;  %v2732_v10 = vld [vmem:[#allocation5 + $0x4c4] ss:$40 sps:$4 sm:$0xff]  }
  0x8b   :  { %1134 = vmatmul.mubr.bf16.vlgmr.msra.gmra.mrb[0].mxu0 %v3083_v9 }
  0x8c   :  { %1184 = vmatpush1.bf16.msra.mxu0 %v2640_v11  ;;  %1215 = vmatprep.mubr.bf16.mxu0 %v3075_v54  ;;  %v2735_v11 = vld [vmem:[#allocation5 + $0x4cc] ss:$40 sps:$4 sm:$0xff]  }
  0x8d   :  { %1175 = vmatmul.mubr.bf16.vlgmr.msra.gmra.mrb[0].mxu1 %v3083_v9  ;;  %1185 = vmatprep.subr.bf16.mxu0 %v2648_v12  ;;  %v2730_v12 = vld [vmem:[#allocation5 + $0x4c0] ss:$40 sps:$4 sm:$0xff]  }
  0x8e   :  { %1225 = vmatpush1.bf16.msra.mxu1 %v2643_v13  ;;  %1256 = vmatprep.mubr.bf16.mxu1 %v3075_v54  ;;  %v2738_v13 = vld [vmem:[#allocation5 + $0x24] ss:$40 sps:$4 sm:$0xff]  }
  0x8f   :  { %1226 = vmatprep.subr.bf16.mxu1 %v2651_v14  ;;  %v2733_v14 = vld [vmem:[#allocation5 + $0x4c8] ss:$40 sps:$4 sm:$0xff]  }
  0x90   :  { %1186 = vmatpush1.bf16.msra.mxu0 %v2646_v15  ;;  %v2784_v15 = vld [vmem:[#allocation8 + $0x40] sm:$0xff]  }
  0x91   :  { %1187 = vmatprep.subr.bf16.mxu0 %v2654_v16  ;;  %v2736_v16 = vld [vmem:[#allocation5 + $0x20] ss:$40 sps:$4 sm:$0xff]  }
  0x92   :  { %1227 = vmatpush1.bf16.msra.mxu1 %v2649_v17  ;;  %v2741_v17 = vld [vmem:[#allocation5 + $0x74] ss:$40 sps:$4 sm:$0xff]  }
  0x93   :  { %1228 = vmatprep.subr.bf16.mxu1 %v2657_v18  ;;  %v2785_v18 = vld [vmem:[#allocation8] sm:$0xff]  }
  0x94   :  { %1188 = vmatpush1.bf16.msra.mxu0 %v2652_v19  ;;  %v2786_v19 = vld [vmem:[#allocation8 + $0x48] sm:$0xff]  }
  0x95   :  { %1189 = vmatprep.subr.bf16.mxu0 %v2660_v20  ;;  %v2739_v20 = vld [vmem:[#allocation5 + $0x70] ss:$40 sps:$4 sm:$0xff]  }
  0x96   :  { %1229 = vmatpush1.bf16.msra.mxu1 %v2655_v21  ;;  %v2744_v21 = vld [vmem:[#allocation5 + $0xc4] ss:$40 sps:$4 sm:$0xff]  }
  0x97   :  { %1230 = vmatprep.subr.bf16.mxu1 %v2663_v22  ;;  %v2787_v22 = vld [vmem:[#allocation8 + $0x8] sm:$0xff]  }
  0x98   :  { %1190 = vmatpush1.bf16.msra.mxu0 %v2658_v23  ;;  %v2788_v23 = vld [vmem:[#allocation8 + $0x50] sm:$0xff]  }
  0x99   :  { %1191 = vmatprep.subr.bf16.mxu0 %v2666_v24  ;;  %v2742_v24 = vld [vmem:[#allocation5 + $0xc0] ss:$40 sps:$4 sm:$0xff]  }
  0x9a   :  { %1231 = vmatpush1.bf16.msra.mxu1 %v2661_v25  ;;  %v2747_v25 = vld [vmem:[#allocation5 + $0x114] ss:$40 sps:$4 sm:$0xff]  }
  0x9b   :  { %1232 = vmatprep.subr.bf16.mxu1 %v2669_v26  ;;  %v2789_v26 = vld [vmem:[#allocation8 + $0x10] sm:$0xff]  }
  0x9c   :  { %1192 = vmatpush1.bf16.msra.mxu0 %v2664_v27  ;;  %v2790_v27 = vld [vmem:[#allocation8 + $0x58] sm:$0xff]  }
  0x9d   :  { %1193 = vmatprep.subr.bf16.mxu0 %v2672_v28  ;;  %v2745_v28 = vld [vmem:[#allocation5 + $0x110] ss:$40 sps:$4 sm:$0xff]  }
  0x9e   :  { %1233 = vmatpush1.bf16.msra.mxu1 %v2667_v29  ;;  %v2750_v29 = vld [vmem:[#allocation5 + $0x164] ss:$40 sps:$4 sm:$0xff]  }
  0x9f   :  { %1234 = vmatprep.subr.bf16.mxu1 %v2675_v30  ;;  %v2791_v30 = vld [vmem:[#allocation8 + $0x18] sm:$0xff]  }
  0xa0   :  { %1194 = vmatpush1.bf16.msra.mxu0 %v2670_v31  ;;  %v2748_v31 = vld [vmem:[#allocation5 + $0x160] ss:$40 sps:$4 sm:$0xff]  }
  0xa1   :  { %1195 = vmatprep.subr.bf16.mxu0 %v2678_v32  ;;  %v2753_v32 = vld [vmem:[#allocation5 + $0x1b4] ss:$40 sps:$4 sm:$0xff]  }
  0xa2   :  { %1235 = vmatpush1.bf16.msra.mxu1 %v2673_v33  ;;  %v2793_v33 = vld [vmem:[#allocation8 + $0x20] sm:$0xff]  }
  0xa3   :  { %1236 = vmatprep.subr.bf16.mxu1 %v2681_v34  ;;  %v2794_v34 = vld [vmem:[#allocation8 + $0x68] sm:$0xff]  }
  0xa4   :  { %1196 = vmatpush1.bf16.msra.mxu0 %v2676_v35  ;;  %v2751_v35 = vld [vmem:[#allocation5 + $0x1b0] ss:$40 sps:$4 sm:$0xff]  }
  0xa5   :  { %1197 = vmatprep.subr.bf16.mxu0 %v2684_v36  ;;  %v2756_v36 = vld [vmem:[#allocation5 + $0x204] ss:$40 sps:$4 sm:$0xff]  }
  0xa6   :  { %1237 = vmatpush1.bf16.msra.mxu1 %v2679_v37  ;;  %v2795_v37 = vld [vmem:[#allocation8 + $0x28] sm:$0xff]  }
  0xa7   :  { %1238 = vmatprep.subr.bf16.mxu1 %v2687_v38  ;;  %v2796_v38 = vld [vmem:[#allocation8 + $0x70] sm:$0xff]  }
  0xa8   :  { %1198 = vmatpush1.bf16.msra.mxu0 %v2682_v39  ;;  %v2754_v39 = vld [vmem:[#allocation5 + $0x200] ss:$40 sps:$4 sm:$0xff]  }
  0xa9   :  { %1199 = vmatprep.subr.bf16.mxu0 %v2690_v41  ;;  %v2759_v41 = vld [vmem:[#allocation5 + $0x254] ss:$40 sps:$4 sm:$0xff]  }
  0xaa   :  { %1239 = vmatpush1.bf16.msra.mxu1 %v2685_v42  ;;  %v2797_v42 = vld [vmem:[#allocation8 + $0x30] sm:$0xff]  }
  0xab   :  { %1240 = vmatprep.subr.bf16.mxu1 %v2693_v43  ;;  %v2798_v43 = vld [vmem:[#allocation8 + $0x78] sm:$0xff]  }
  0xac   :  { %1200 = vmatpush1.bf16.msra.mxu0 %v2688_v44  ;;  %v2757_v44 = vld [vmem:[#allocation5 + $0x250] ss:$40 sps:$4 sm:$0xff]  }
  0xad   :  { %1201 = vmatprep.subr.bf16.mxu0 %v2696_v46  ;;  %v2762_v46 = vld [vmem:[#allocation5 + $0x2a4] ss:$40 sps:$4 sm:$0xff]  }
  0xae   :  { %1241 = vmatpush1.bf16.msra.mxu1 %v2691_v47  ;;  %v2799_v47 = vld [vmem:[#allocation8 + $0x38] sm:$0xff]  }
  0xaf   :  { %1242 = vmatprep.subr.bf16.mxu1 %v2699_v48  ;;  %v2800_v48 = vld [vmem:[#allocation8 + $0xc0] sm:$0xff]  }
  0xb0   :  { %1202 = vmatpush1.bf16.msra.mxu0 %v2694_v49  ;;  %v2760_v49 = vld [vmem:[#allocation5 + $0x2a0] ss:$40 sps:$4 sm:$0xff]  }
  0xb1   :  { %1203 = vmatprep.subr.bf16.mxu0 %v2702_v50  ;;  %v2765_v50 = vld [vmem:[#allocation5 + $0x2f4] ss:$40 sps:$4 sm:$0xff]  }
  0xb2   :  { %1243 = vmatpush1.bf16.msra.mxu1 %v2697_v51  ;;  %v2763_v51 = vld [vmem:[#allocation5 + $0x2f0] ss:$40 sps:$4 sm:$0xff]  }
  0xb3   :  { %1244 = vmatprep.subr.bf16.mxu1 %v2705_v52  ;;  %v2768_v52 = vld [vmem:[#allocation5 + $0x344] ss:$40 sps:$4 sm:$0xff]  }
  0xb4   :  { %1204 = vmatpush1.bf16.msra.mxu0 %v2700_v53  ;;  %v2766_v53 = vld [vmem:[#allocation5 + $0x340] ss:$40 sps:$4 sm:$0xff]  }
  0xb5   :  { %1205 = vmatprep.subr.bf16.mxu0 %v2708_v55  ;;  %v2771_v55 = vld [vmem:[#allocation5 + $0x394] ss:$40 sps:$4 sm:$0xff]  }
  0xb6   :  { %1245 = vmatpush1.bf16.msra.mxu1 %v2703_v56  ;;  %v2769_v56 = vld [vmem:[#allocation5 + $0x390] ss:$40 sps:$4 sm:$0xff]  }
  0xb7   :  { %1246 = vmatprep.subr.bf16.mxu1 %v2711_v58  ;;  %v2772_v58 = vld [vmem:[#allocation5 + $0x3e0] ss:$40 sps:$4 sm:$0xff]  }
  0xb8   :  { %1206 = vmatpush1.bf16.msra.mxu0 %v2706_v57  ;;  %v2774_v57 = vld [vmem:[#allocation5 + $0x3e4] ss:$40 sps:$4 sm:$0xff]  }
  0xb9   :  { %1207 = vmatprep.subr.bf16.mxu0 %v2714_v60  ;;  %v2775_v60 = vld [vmem:[#allocation5 + $0x430] ss:$40 sps:$4 sm:$0xff]  }
  0xba   :  { %1247 = vmatpush1.bf16.msra.mxu1 %v2709_v59  ;;  %v2777_v59 = vld [vmem:[#allocation5 + $0x434] ss:$40 sps:$4 sm:$0xff]  }
  0xbb   :  { %1248 = vmatprep.subr.bf16.mxu1 %v2717_v62  ;;  %v2778_v62 = vld [vmem:[#allocation5 + $0x480] ss:$40 sps:$4 sm:$0xff]  }
  0xbc   :  { %1208 = vmatpush1.bf16.msra.mxu0 %v2712_v61  ;;  %v2780_v61 = vld [vmem:[#allocation5 + $0x484] ss:$40 sps:$4 sm:$0xff]  }
  0xbd   :  { %1209 = vmatprep.subr.bf16.mxu0 %v2720_v1  ;;  %v2781_v1 = vld [vmem:[#allocation5 + $0x4d0] ss:$40 sps:$4 sm:$0xff]  }
  0xbe   :  { %1249 = vmatpush1.bf16.msra.mxu1 %v2715_v63  ;;  %v2783_v63 = vld [vmem:[#allocation5 + $0x4d4] ss:$40 sps:$4 sm:$0xff]  }
  0xbf   :  { %1250 = vmatprep.subr.bf16.mxu1 %v2723_v3  ;;  %v2817_v3 = vld [vmem:[#allocation8 + $0x100] sm:$0xff]  }
  0xc0   :  { %1210 = vmatpush1.bf16.msra.mxu0 %v2718_v2  ;;  %v2816_v2 = vld [vmem:[#allocation8 + $0x140] sm:$0xff]  }
  0xc1   :  { %1211 = vmatprep.subr.bf16.mxu0 %v2726_v5  ;;  %v2821_v5 = vld [vmem:[#allocation8 + $0x108] sm:$0xff]  }
  0xc2   :  { %1251 = vmatpush1.bf16.msra.mxu1 %v2721_v4  ;;  %v2820_v4 = vld [vmem:[#allocation8 + $0x148] sm:$0xff]  }
  0xc3   :  { %1252 = vmatprep.subr.bf16.mxu1 %v2729_v7  ;;  %v2825_v7 = vld [vmem:[#allocation8 + $0x110] sm:$0xff]  }
  0xc4   :  { %1212 = vmatpush1.bf16.msra.mxu0 %v2724_v6  ;;  %v2824_v6 = vld [vmem:[#allocation8 + $0x150] sm:$0xff]  }
  0xc5   :  { %1213 = vmatprep.subr.bf16.mxu0 %v2732_v10  ;;  %v2829_v10 = vld [vmem:[#allocation8 + $0x118] sm:$0xff]  }
  0xc6   :  { %1253 = vmatpush1.bf16.msra.mxu1 %v2727_v8  ;;  %v2828_v8 = vld [vmem:[#allocation8 + $0x158] sm:$0xff]  }
  0xc7   :  { %1254 = vmatprep.subr.bf16.mxu1 %v2735_v11  ;;  %v2832_v11 = vld [vmem:[#allocation8 + $0x160] sm:$0xff]  }
  0xc8   :  { %1214 = vmatpush1.bf16.msra.mxu0 %v2730_v12  ;;  %v2833_v12 = vld [vmem:[#allocation8 + $0x120] sm:$0xff]  }
  0xc9   :  { %1265 = vmatprep.subr.bf16.mxu0 %v2738_v13  ;;  %v2836_v13 = vld [vmem:[#allocation8 + $0x168] sm:$0xff]  }
  0xca   :  { %1255 = vmatpush1.bf16.msra.mxu1 %v2733_v14  ;;  %v2837_v14 = vld [vmem:[#allocation8 + $0x128] sm:$0xff]  }
  0xcb   :  { %1216 = vmatmul.mubr.bf16.vlgmr.msra.gmra.mrb[4].mxu0 %v3083_v9  ;;  %2425 = vmatprep.subr.bf16.mxu1 %v2784_v15  ;;  %v2841_v15 = vld [vmem:[#allocation8 + $0x130] sm:$0xff]  }
  0xcc   :  { %1266 = vmatpush1.bf16.msra.mxu0 %v2736_v16  ;;  %1297 = vmatprep.mubr.bf16.mxu0 %v3075_v54  ;;  %v2792_v54 = vld [vmem:[#allocation8 + $0x60] sm:$0xff]   ;;  %v2844_v16 = vld [vmem:[#allocation8 + $0x178] sm:$0xff]  }
  0xcd   :  { %1257 = vmatmul.mubr.bf16.vlgmr.msra.gmra.mrb[4].mxu1 %v3083_v9  ;;  %1267 = vmatprep.subr.bf16.mxu0 %v2741_v17  ;;  %v2845_v17 = vld [vmem:[#allocation8 + $0x138] sm:$0xff]  }
  0xce   :  { %2426 = vmatpush3.bf16.msra.mxu1 %v2785_v18  ;;  %v2848_v18 = vld [vmem:[#allocation8 + $0x240] sm:$0xff]  }
  0xcf   :  { %2427 = vmatprep.subr.bf16.mxu1 %v2786_v19  ;;  %v3093_v19 = vld [vmem:[#allocation7] sm:$0xff] }
  0xd0   :  { %1268 = vmatpush1.bf16.msra.mxu0 %v2739_v20  ;;  %v1065_v20 = vsub.s32 3, %v3069_v40 }
  0xd1   :  { %1269 = vmatprep.subr.bf16.mxu0 %v2744_v21  ;;  %v1054_v21 = vrot.slane %v3093_v19, %v3080_v0 }
  0xd2   :  { %2428 = vmatpush3.bf16.msra.mxu1 %v2787_v22  ;;  %v1058_v22 = vrot.slane %v3093_v19, %v3072_v45 }
  0xd3   :  { %2429 = vmatprep.subr.bf16.mxu1 %v2788_v23 }
  0xd4   :  { %1270 = vmatpush1.bf16.msra.mxu0 %v2742_v24  ;;  %v1066_v24 = vrot.slane %v3093_v19, %v1065_v20  ;;  %v2843_v20 = vld [vmem:[#allocation8 + $0x1b0] sm:$0xff]  }
  0xd5   :  { %1271 = vmatprep.subr.bf16.mxu0 %v2747_v25 }
  0xd6   :  { %2430 = vmatpush3.bf16.msra.mxu1 %v2789_v26 }
  0xd7   :  { %2431 = vmatprep.subr.bf16.mxu1 %v2790_v27 }
  0xd8   :  { %1272 = vmatpush1.bf16.msra.mxu0 %v2745_v28 }
  0xd9   :  { %1273 = vmatprep.subr.bf16.mxu0 %v2750_v29 }
  0xda   :  { %2432 = vmatpush3.bf16.msra.mxu1 %v2791_v30 }
  0xdb   :  { %2433 = vmatprep.subr.bf16.mxu1 %v2792_v54 }
  0xdc   :  { %1274 = vmatpush1.bf16.msra.mxu0 %v2748_v31 }
  0xdd   :  { %1275 = vmatprep.subr.bf16.mxu0 %v2753_v32 }
  0xde   :  { %2434 = vmatpush3.bf16.msra.mxu1 %v2793_v33 }
  0xdf   :  { %2435 = vmatprep.subr.bf16.mxu1 %v2794_v34 }
  0xe0   :  { %1276 = vmatpush1.bf16.msra.mxu0 %v2751_v35 }
  0xe1   :  { %1277 = vmatprep.subr.bf16.mxu0 %v2756_v36 }
  0xe2   :  { %2436 = vmatpush3.bf16.msra.mxu1 %v2795_v37 }
  0xe3   :  { %2437 = vmatprep.subr.bf16.mxu1 %v2796_v38  ;;  %v2801_v38 = vld [vmem:[#allocation8 + $0x80] sm:$0xff]  }
  0xe4   :  { %1278 = vmatpush1.bf16.msra.mxu0 %v2754_v39 }
  0xe5   :  { %1279 = vmatprep.subr.bf16.mxu0 %v2759_v41  ;;  %v2802_v41 = vld [vmem:[#allocation8 + $0xc8] sm:$0xff]  }
  0xe6   :  { %2438 = vmatpush3.bf16.msra.mxu1 %v2797_v42 }
  0xe7   :  { %2439 = vmatprep.subr.bf16.mxu1 %v2798_v43  ;;  %v2803_v43 = vld [vmem:[#allocation8 + $0x88] sm:$0xff]  }
  0xe8   :  { %1280 = vmatpush1.bf16.msra.mxu0 %v2757_v44  ;;  %v2804_v44 = vld [vmem:[#allocation8 + $0xd0] sm:$0xff]  }
  0xe9   :  { %1281 = vmatprep.subr.bf16.mxu0 %v2762_v46  ;;  %v2805_v46 = vld [vmem:[#allocation8 + $0x90] sm:$0xff]  }
  0xea   :  { %2440 = vmatpush3.bf16.msra.mxu1 %v2799_v47  ;;  %v2806_v47 = vld [vmem:[#allocation8 + $0xd8] sm:$0xff]  }
  0xeb   :  { %2447 = vmatprep.subr.bf16.mxu1 %v2800_v48  ;;  %v2807_v48 = vld [vmem:[#allocation8 + $0x98] sm:$0xff]  }
  0xec   :  { %1282 = vmatpush1.bf16.msra.mxu0 %v2760_v49  ;;  %v2808_v49 = vld [vmem:[#allocation8 + $0xe0] sm:$0xff]  }
  0xed   :  { %1283 = vmatprep.subr.bf16.mxu0 %v2765_v50  ;;  %v1061_v50 = vsub.s32 2, %v3069_v40 }
  0xf0   :  { %1284 = vmatpush1.bf16.msra.mxu0 %v2763_v51  ;;  %v2809_v51 = vld [vmem:[#allocation8 + $0xa0] sm:$0xff]  }
  0xf1   :  { %1285 = vmatprep.subr.bf16.mxu0 %v2768_v52  ;;  %v2810_v52 = vld [vmem:[#allocation8 + $0xe8] sm:$0xff]  }
  0xf4   :  { %1286 = vmatpush1.bf16.msra.mxu0 %v2766_v53  ;;  %v1062_v53 = vrot.slane %v3093_v19, %v1061_v50  ;;  %v2855_v50 = vld [vmem:[#allocation8 + $0x218] sm:$0xff]  }
  0xf5   :  { %1287 = vmatprep.subr.bf16.mxu0 %v2771_v55  ;;  %v2811_v55 = vld [vmem:[#allocation8 + $0xa8] sm:$0xff]  }
  0xf8   :  { %1288 = vmatpush1.bf16.msra.mxu0 %v2769_v56  ;;  %v2812_v56 = vld [vmem:[#allocation8 + $0xf0] sm:$0xff]  }
  0xf9   :  { %1289 = vmatprep.subr.bf16.mxu0 %v2774_v57 }
  0xfc   :  { %1290 = vmatpush1.bf16.msra.mxu0 %v2772_v58  ;;  %v2813_v58 = vld [vmem:[#allocation8 + $0xb0] sm:$0xff]  }
  0xfd   :  { %1291 = vmatprep.subr.bf16.mxu0 %v2777_v59  ;;  %v2814_v59 = vld [vmem:[#allocation8 + $0xf8] sm:$0xff]  }
 0x100   :  { %1292 = vmatpush1.bf16.msra.mxu0 %v2775_v60 }
 0x101   :  { %1293 = vmatprep.subr.bf16.mxu0 %v2780_v61  ;;  %v2815_v61 = vld [vmem:[#allocation8 + $0xb8] sm:$0xff]  }
 0x104   :  { %1294 = vmatpush1.bf16.msra.mxu0 %v2778_v62  ;;  %v2818_v62 = vld [vmem:[#allocation8 + $0x1c0] sm:$0xff]  }
 0x105   :  { %1295 = vmatprep.subr.bf16.mxu0 %v2783_v63 }
 0x108   :  { %1296 = vmatpush1.bf16.msra.mxu0 %v2781_v1  ;;  %v2819_v1 = vld [vmem:[#allocation8 + $0x180] sm:$0xff]  }
 0x109   :  { %2469 = vmatprep.subr.bf16.mxu0 %v2816_v2  ;;  %v2822_v2 = vld [vmem:[#allocation8 + $0x1c8] sm:$0xff]  }
 0x10b   :  { %1298 = vmatmul.mubr.bf16.vlgmr.msra.gmra.mrb[8].mxu0 %v3083_v9  ;;  %v2840_v9 = vld [vmem:[#allocation8 + $0x170] sm:$0xff]  }
 0x10c   :  { %2470 = vmatpush3.bf16.msra.mxu0 %v2817_v3  ;;  %v2823_v3 = vld [vmem:[#allocation8 + $0x188] sm:$0xff]  }
 0x10d   :  { %2471 = vmatprep.subr.bf16.mxu0 %v2820_v4  ;;  %v2826_v4 = vld [vmem:[#allocation8 + $0x1d0] sm:$0xff]  }
 0x110   :  { %2472 = vmatpush3.bf16.msra.mxu0 %v2821_v5  ;;  %v2827_v5 = vld [vmem:[#allocation8 + $0x190] sm:$0xff]  }
 0x111   :  { %2473 = vmatprep.subr.bf16.mxu0 %v2824_v6  ;;  %v2830_v6 = vld [vmem:[#allocation8 + $0x1d8] sm:$0xff]  }
 0x114   :  { %2474 = vmatpush3.bf16.msra.mxu0 %v2825_v7  ;;  %v2831_v7 = vld [vmem:[#allocation8 + $0x198] sm:$0xff]  }
 0x115   :  { %2475 = vmatprep.subr.bf16.mxu0 %v2828_v8  ;;  %v2834_v8 = vld [vmem:[#allocation8 + $0x1e0] sm:$0xff]  }
 0x118   :  { %2476 = vmatpush3.bf16.msra.mxu0 %v2829_v10  ;;  %v2835_v10 = vld [vmem:[#allocation8 + $0x1a0] sm:$0xff]  }
 0x119   :  { %2477 = vmatprep.subr.bf16.mxu0 %v2832_v11  ;;  %v2838_v11 = vld [vmem:[#allocation8 + $0x1e8] sm:$0xff]  }
 0x11c   :  { %2478 = vmatpush3.bf16.msra.mxu0 %v2833_v12  ;;  %v1069_v12 = vsub.s32 4, %v3069_v40 }
 0x11d   :  { %2479 = vmatprep.subr.bf16.mxu0 %v2836_v13  ;;  %v2839_v13 = vld [vmem:[#allocation8 + $0x1a8] sm:$0xff]  }
 0x120   :  { %2480 = vmatpush3.bf16.msra.mxu0 %v2837_v14  ;;  %v1073_v14 = vsub.s32 5, %v3069_v40 }
 0x121   :  { %2481 = vmatprep.subr.bf16.mxu0 %v2840_v9  ;;  %v1077_v9 = vsub.s32 6, %v3069_v40 }
 0x124   :  { %2482 = vmatpush3.bf16.msra.mxu0 %v2841_v15  ;;  %v2842_v15 = vld [vmem:[#allocation8 + $0x1f0] sm:$0xff]  }
 0x125   :  { %2483 = vmatprep.subr.bf16.mxu0 %v2844_v16  ;;  %v1081_v16 = vsub.s32 7, %v3069_v40  ;;  %v2847_v40 = vld [vmem:[#allocation8 + $0x1b8] sm:$0xff]  }
 0x128   :  { %2484 = vmatpush3.bf16.msra.mxu0 %v2845_v17  ;;  %v1070_v17 = vrot.slane %v3093_v19, %v1069_v12 }
 0x129   :  { %2513 = vmatprep.subr.bf16.mxu0 %v2848_v18  ;;  %v1074_v18 = vrot.slane %v3093_v19, %v1073_v14 }
 0x15e   :  { %v1135_v23 = vpop.f32.mrb[0].mxu0 }
 0x15f   :  { %v1136_v25 = vadd.f32 %v1135_v23, %v1054_v21  ;;  %v1137_v26 = vpop.f32.mrb[1].mxu0  ;;  %v1078_v21 = vrot.slane %v3093_v19, %v1077_v9 }
 0x160   :  { %v1138_v27 = vadd.f32 %v1137_v26, %v1058_v22  ;;  %v1139_v28 = vpop.f32.mrb[2].mxu0  ;;  %v1176_v29 = vpop.f32.mrb[0].mxu1  ;;  %v2846_v22 = vld [vmem:[#allocation8 + $0x1f8] sm:$0xff]  }
 0x161   :  { %v1306_v30 = vmax.f32 %v1136_v25, 0.0  ;;  %v1140_v54 = vpop.f32.mrb[3].mxu0  ;;  %v1178_v31 = vpop.f32.mrb[1].mxu1  ;;  %v1177_v57 = vadd.f32 %v1176_v29, %v1062_v53  ;;  %v2858_v53 = vld [vmem:[#allocation8 + $0x268] sm:$0xff]  }
 0x162   :  { %v1307_v32 = vmax.f32 %v1138_v27, 0.0  ;;  %v1179_v33 = vadd.f32 %v1178_v31, %v1066_v24  ;;  %v1180_v34 = vpop.f32.mrb[2].mxu1  ;;  %v1082_v24 = vrot.slane %v3093_v19, %v1081_v16 }
 0x163   :  { %v1316_v35 = vpack.c.bf16 %v1306_v30, %v1306_v30  ;;  %v1181_v36 = vpop.f32.mrb[3].mxu1  ;;  %v1308_v60 = vmax.f32 %v1177_v57, 0.0  ;;  %v2861_v57 = vld [vmem:[#allocation8 + $0x230] sm:$0xff]  }
 0x164   :  { %v1317_v37 = vpack.c.bf16 %v1307_v32, %v1307_v32  ;;  %v1309_v39 = vmax.f32 %v1179_v33, 0.0 }
 0x165   :  { %v1318_v63 = vpack.c.bf16 %v1308_v60, %v1308_v60  ;;  %v248_v60 = vld [vmem:[#allocation7 + $0x8] sm:$0x3] }
 0x166   :  { %1999 = vmatprep.mubr.bf16.mxu1 %v1317_v37  ;;  %v1319_v42 = vpack.c.bf16 %v1309_v39, %v1309_v39 }
 0x167   :  { %2000 = vmatmul.mubr.bf16.vlgmr.msra.gmra.mrb[8].mxu1 %v1316_v35 }
 0x168   :  { %2448 = vmatpush3.bf16.msra.mxu1 %v2801_v38  ;;  %2039 = vmatprep.mubr.bf16.mxu1 %v1319_v42 }
 0x169   :  { %2449 = vmatprep.subr.bf16.mxu1 %v2802_v41  ;;  %v2849_v41 = vld [vmem:[#allocation8 + $0x200] sm:$0xff]  }
 0x16c   :  { %2450 = vmatpush3.bf16.msra.mxu1 %v2803_v43  ;;  %v2850_v43 = vld [vmem:[#allocation8 + $0x248] sm:$0xff]  }
 0x16d   :  { %2451 = vmatprep.subr.bf16.mxu1 %v2804_v44 }
 0x170   :  { %2452 = vmatpush3.bf16.msra.mxu1 %v2805_v46  ;;  %v2851_v46 = vld [vmem:[#allocation8 + $0x208] sm:$0xff]  }
 0x171   :  { %2453 = vmatprep.subr.bf16.mxu1 %v2806_v47  ;;  %v2852_v47 = vld [vmem:[#allocation8 + $0x250] sm:$0xff]  }
 0x174   :  { %2454 = vmatpush3.bf16.msra.mxu1 %v2807_v48  ;;  %v2853_v48 = vld [vmem:[#allocation8 + $0x210] sm:$0xff]  }
 0x175   :  { %2455 = vmatprep.subr.bf16.mxu1 %v2808_v49  ;;  %v2854_v49 = vld [vmem:[#allocation8 + $0x258] sm:$0xff]  }
 0x178   :  { %2456 = vmatpush3.bf16.msra.mxu1 %v2809_v51  ;;  %v2856_v51 = vld [vmem:[#allocation8 + $0x260] sm:$0xff]  }
 0x179   :  { %2457 = vmatprep.subr.bf16.mxu1 %v2810_v52  ;;  %v2857_v52 = vld [vmem:[#allocation8 + $0x220] sm:$0xff]  }
 0x17c   :  { %2458 = vmatpush3.bf16.msra.mxu1 %v2811_v55  ;;  %v2859_v55 = vld [vmem:[#allocation8 + $0x228] sm:$0xff]  }
 0x17d   :  { %2459 = vmatprep.subr.bf16.mxu1 %v2812_v56  ;;  %v2860_v56 = vld [vmem:[#allocation8 + $0x270] sm:$0xff]  }
 0x180   :  { %2460 = vmatpush3.bf16.msra.mxu1 %v2813_v58  ;;  %v2862_v58 = vld [vmem:[#allocation8 + $0x278] sm:$0xff]  }
 0x181   :  { %2461 = vmatprep.subr.bf16.mxu1 %v2814_v59  ;;  %v2863_v59 = vld [vmem:[#allocation8 + $0x238] sm:$0xff]  }
 0x184   :  { %2462 = vmatpush3.bf16.msra.mxu1 %v2815_v61  ;;  %v1086_v61 = vrot.slane %v248_v60, %v3080_v0 }
 0x185   :  { %2491 = vmatprep.subr.bf16.mxu1 %v2818_v62  ;;  %v1090_v62 = vrot.slane %v248_v60, %v3072_v45  ;;  %v1486_v45 = vld [vmem:[%s3132_s4] sm:$0x1]  ;;  %s2990_s4 = smov [#allocation10]  }
 0x186   :  { %s2174_s1 = sshll.u32 %s2990_s4, 4  ;;  %s2175_s1 = int_to_ptr.vmem [resolvable:$true] %s2174_s1 }
 0x187   :  { %2040 = vmatmul.mubr.bf16.vlgmr.msra.gmra.mrb[12].mxu1 %v1318_v63  ;;  %s2952_s18 = scalar_lea.vmem %s2175_s1, 16  ;;  %s2956_s19 = scalar_lea.vmem %s2175_s1, 32 }
 0x188   :  { %2492 = vmatpush3.bf16.msra.mxu1 %v2819_v1  ;;  %p2953_p4 = scmp.ne.s32.totalorder %s2175_s1, %s2952_s18  ;;  %p2957_p5 = scmp.lt.s32.totalorder %s2175_s1, %s2175_s1 }
 0x189   :  { %2493 = vmatprep.subr.bf16.mxu1 %v2822_v2  ;;  %p2958_p6 = scmp.lt.s32.totalorder %s2956_s19, %s2952_s18 }
 0x18b   :  { %p2959_p7 = por %p2958_p6, %p2957_p5 }
 0x18c   :  { %2494 = vmatpush3.bf16.msra.mxu1 %v2823_v3 }
 0x18d   :  { %2495 = vmatprep.subr.bf16.mxu1 %v2826_v4  ;;  %p2960_p8 = pnand %p2959_p7, %p2953_p4 }
 0x190   :  { %2496 = vmatpush3.bf16.msra.mxu1 %v2827_v5 }
 0x191   :  { %2497 = vmatprep.subr.bf16.mxu1 %v2830_v6 }
 0x194   :  { %2498 = vmatpush3.bf16.msra.mxu1 %v2831_v7 }
 0x195   :  { %2499 = vmatprep.subr.bf16.mxu1 %v2834_v8 }
 0x198   :  { %2500 = vmatpush3.bf16.msra.mxu1 %v2835_v10 }
 0x199   :  { %2501 = vmatprep.subr.bf16.mxu1 %v2838_v11 }
 0x19c   :  { %2502 = vmatpush3.bf16.msra.mxu1 %v2839_v13 }
 0x19d   :  { %2503 = vmatprep.subr.bf16.mxu1 %v2842_v15 }
 0x19e   :  { %v1217_v23 = vpop.f32.mrb[4].mxu0 }
 0x19f   :  { %v1218_v25 = vadd.f32 %v1217_v23, %v1070_v17  ;;  %v1219_v26 = vpop.f32.mrb[5].mxu0 }
 0x1a0   :  { %v1220_v27 = vadd.f32 %v1219_v26, %v1074_v18  ;;  %v1221_v28 = vpop.f32.mrb[6].mxu0  ;;  %v1258_v29 = vpop.f32.mrb[4].mxu1  ;;  %2504 = vmatpush3.bf16.msra.mxu1 %v2843_v20 }
 0x1a1   :  { %v1310_v30 = vmax.f32 %v1218_v25, 0.0  ;;  %v1259_v54 = vadd.f32 %v1258_v29, %v1078_v21  ;;  %v1222_v31 = vpop.f32.mrb[7].mxu0  ;;  %v1260_v32 = vpop.f32.mrb[5].mxu1  ;;  %2505 = vmatprep.subr.bf16.mxu1 %v2846_v22 }
 0x1a2   :  { %v1311_v33 = vmax.f32 %v1220_v27, 0.0  ;;  %v1261_v34 = vadd.f32 %v1260_v32, %v1082_v24  ;;  %v1262_v35 = vpop.f32.mrb[6].mxu1 }
 0x1a3   :  { %v1320_v36 = vpack.c.bf16 %v1310_v30, %v1310_v30  ;;  %v1312_v37 = vmax.f32 %v1259_v54, 0.0  ;;  %v1263_v38 = vpop.f32.mrb[7].mxu1 }
 0x1a4   :  { %v1321_v39 = vpack.c.bf16 %v1311_v33, %v1311_v33  ;;  %v1313_v19 = vmax.f32 %v1261_v34, 0.0  ;;  %2506 = vmatpush3.bf16.msra.mxu1 %v2847_v40 }
 0x1a5   :  { %v1322_v42 = vpack.c.bf16 %v1312_v37, %v1312_v37 }
 0x1a6   :  { %v1323_v44 = vpack.c.bf16 %v1313_v19, %v1313_v19  ;;  %2079 = vmatprep.mubr.bf16.mxu0 %v1321_v39 }
 0x1a7   :  { %2080 = vmatmul.mubr.bf16.vlgmr.msra.gmra.mrb[12].mxu0 %v1320_v36 }
 0x1a8   :  { %2119 = vmatprep.mubr.bf16.mxu1 %v1323_v44  ;;  %2514 = vmatpush3.bf16.msra.mxu0 %v2849_v41 }
 0x1a9   :  { %2120 = vmatmul.mubr.bf16.vlgmr.msra.gmra.mrb[16].mxu1 %v1322_v42  ;;  %2515 = vmatprep.subr.bf16.mxu0 %v2850_v43 }
 0x1ac   :  { %2516 = vmatpush3.bf16.msra.mxu0 %v2851_v46 }
 0x1ad   :  { %2517 = vmatprep.subr.bf16.mxu0 %v2852_v47 }
 0x1b0   :  { %2518 = vmatpush3.bf16.msra.mxu0 %v2853_v48 }
 0x1b1   :  { %2519 = vmatprep.subr.bf16.mxu0 %v2854_v49 }
 0x1b4   :  { %2520 = vmatpush3.bf16.msra.mxu0 %v2855_v50 }
 0x1b5   :  { %2521 = vmatprep.subr.bf16.mxu0 %v2856_v51 }
 0x1b8   :  { %2522 = vmatpush3.bf16.msra.mxu0 %v2857_v52 }
 0x1b9   :  { %2523 = vmatprep.subr.bf16.mxu0 %v2858_v53 }
 0x1bc   :  { %2524 = vmatpush3.bf16.msra.mxu0 %v2859_v55 }
 0x1bd   :  { %2525 = vmatprep.subr.bf16.mxu0 %v2860_v56 }
 0x1c0   :  { %2526 = vmatpush3.bf16.msra.mxu0 %v2861_v57 }
 0x1c1   :  { %2527 = vmatprep.subr.bf16.mxu0 %v2862_v58 }
 0x1c4   :  { %2528 = vmatpush3.bf16.msra.mxu0 %v2863_v59 }
 0x1de   :  { %v1299_v63 = vpop.f32.mrb[8].mxu0 }
 0x1df   :  { %v1300_v1 = vadd.f32 %v1299_v63, %v1086_v61  ;;  %v1301_v2 = vpop.f32.mrb[9].mxu0 }
 0x1e0   :  { %v1302_v3 = vadd.f32 %v1301_v2, %v1090_v62  ;;  %v1303_v4 = vpop.f32.mrb[10].mxu0 }
 0x1e1   :  { %v1314_v5 = vmax.f32 %v1300_v1, 0.0  ;;  %v1304_v6 = vpop.f32.mrb[11].mxu0 }
 0x1e2   :  { %v1315_v7 = vmax.f32 %v1302_v3, 0.0 }
 0x1e3   :  { %v1324_v10 = vpack.c.bf16 %v1314_v5, %v1314_v5 }
 0x1e4   :  { %v1325_v8 = vpack.c.bf16 %v1315_v7, %v1315_v7 }
 0x1e6   :  { %2159 = vmatprep.mubr.bf16.mxu0 %v1325_v8 }
 0x1e7   :  { %2160 = vmatmul.mubr.bf16.vlgmr.msra.gmra.mrb[16].mxu0 %v1324_v10 }
 0x23a   :  { %v2441_v11 = vpop.f32.mrb[8].mxu1 }
 0x23b   :  { %v2442_v12 = vpop.f32.mrb[9].mxu1 }
 0x23c   :  { %v2443_v13 = vadd.f32 %v2442_v12, %v2441_v11  ;;  %v2444_v14 = vpop.f32.mrb[10].mxu1 }
 0x23d   :  { %v2445_v9 = vpop.f32.mrb[11].mxu1 }
 0x23e   :  { %v2002_v16 = vadd.f32 %v2443_v13, %v1486_v45 }
 0x25a   :  { %v2463_v0 = vpop.f32.mrb[12].mxu1 }
 0x25b   :  { %v2464_v15 = vpop.f32.mrb[13].mxu1 }
 0x25c   :  { %v2465_v17 = vadd.f32 %v2464_v15, %v2463_v0  ;;  %v2466_v18 = vpop.f32.mrb[14].mxu1 }
 0x25d   :  { %v2467_v20 = vpop.f32.mrb[15].mxu1 }
 0x25e   :  { %v2042_v21 = vadd.f32 %v2465_v17, %v2002_v16 }
 0x27a   :  { %v2485_v22 = vpop.f32.mrb[12].mxu0 }
 0x27b   :  { %v2486_v23 = vpop.f32.mrb[13].mxu0 }
 0x27c   :  { %v2487_v24 = vadd.f32 %v2486_v23, %v2485_v22  ;;  %v2488_v25 = vpop.f32.mrb[14].mxu0  ;;  %v2507_v26 = vpop.f32.mrb[16].mxu1 }
 0x27d   :  { %v2489_v27 = vpop.f32.mrb[15].mxu0  ;;  %v2508_v28 = vpop.f32.mrb[17].mxu1 }
 0x27e   :  { %v2082_v29 = vadd.f32 %v2487_v24, %v2042_v21  ;;  %v2509_v40 = vadd.f32 %v2508_v28, %v2507_v26  ;;  %v2510_v30 = vpop.f32.mrb[18].mxu1 }
 0x27f   :  { %v2511_v54 = vpop.f32.mrb[19].mxu1 }
 0x280   :  { %v2122_v31 = vadd.f32 %v2509_v40, %v2082_v29 }
 0x2ba   :  { %v2529_v32 = vpop.f32.mrb[16].mxu0 }
 0x2bb   :  { %v2530_v33 = vpop.f32.mrb[17].mxu0 }
 0x2bc   :  { %v2531_v34 = vadd.f32 %v2530_v33, %v2529_v32  ;;  %v2532_v35 = vpop.f32.mrb[18].mxu0 }
 0x2bd   :  { %v2533_v36 = vpop.f32.mrb[19].mxu0 }
 0x2be   :  { %v2162_v37 = vadd.f32 %v2531_v34, %v2122_v31 }
 0x2c0   :  { %2167 = vst [vmem:[#allocation10] sm:$0x1] %v2162_v37 }
 0x2c1   :  { %2963 = shalt.err (!%p2960_p8)
}
 0x2c2   :  { %s2964_s22 = scalar_lea.hbm %s3133_s5, 16 }
 0x2c3   :  { %p2965_p9 = scmp.ne.s32.totalorder %s3133_s5, %s2964_s22  ;;  %p2968_p10 = scmp.lt.u32.totalorder %s2964_s22, %s3133_s5 }
 0x2c5   :  { %p2970_p11 = pnand %p2968_p10, %p2965_p9 }
 0x2c7   :  { %2973 = shalt.err (!%p2970_p11)
}
 0x2c8   :  { %2177 = dma.vmem_to_hbm [thread:$0]  %s2175_s1, 16, %s3133_s5, [#allocation4]  }
 0x2c9   :  { %2980 = dma.done.wait [#allocation4], 16  }
 0x2ca   :  { %2981 = vsyncadd [#allocation4], 4294967280 }
 0x2cb   :  { %2181 = vsyncpa [#allocation3], 1 }
 0x2cc   :  { %2182 = vsyncpa [#allocation6], 1 }
 0x2cd   :  { %2183 = vsyncpa [#allocation9], 1 }
 0x2ce   :  { %2184 = vsyncpa [#allocation4], 1 }

// kernel: tpu_custom_call.1
= control target key start
LH: loop header
LB: loop body
LE: loop exit
PB: predicated region body
PF: predicated region fallthrough
CT: control target
= control target key end

     0   :  { %10 = vsyncpa [#allocation3], 0  ;;  %s3128_s0 = inlined_call_operand.hbm [shape: f32[1,256], index: 0, kind: input, shape index: {}]   ;;  %s3129_s1 = inlined_call_operand.hbm [shape: bf16[256,1280], index: 1, kind: input, shape index: {}]   ;;  %s3130_s2 = inlined_call_operand.hbm [shape: f32[1,1280], index: 2, kind: input, shape index: {}]   ;;  %s3131_s3 = inlined_call_operand.hbm [shape: bf16[1280,128], index: 3, kind: input, shape index: {}]   ;;  %s3132_s4 = inlined_call_operand.vmem [shape: f32[1,128], index: 4, kind: input, shape index: {}]   ;;  %s3133_s5 = inlined_call_operand.hbm [shape: f32[1,128], index: 5, kind: output, shape index: {}]  }
   0x1   :  { %11 = vsyncpa [#allocation6], 0 }
   0x2   :  { %12 = vsyncpa [#allocation9], 0 }
   0x3   :  { %13 = vsyncpa [#allocation4], 0  ;;  %s2982_s18 = smov [#allocation5]   ;;  %s2864_s22 = scalar_lea.hbm %s3129_s1, 20480 }
   0x4   :  { %s29_s19 = sshll.u32 %s2982_s18, 4  ;;  %p2865_p0 = scmp.ne.s32.totalorder %s3129_s1, %s2864_s22  ;;  %s30_s19 = int_to_ptr.vmem [resolvable:$true] %s29_s19 }
   0x5   :  { %p2868_p1 = scmp.lt.u32.totalorder %s2864_s22, %s3129_s1 }
   0x7   :  { %p2870_p2 = pnand %p2868_p1, %p2865_p0 }
   0x9   :  { %2873 = shalt.err (!%p2870_p2)
}
   0xa   :  { %s2874_s27 = scalar_lea.vmem %s30_s19, 20480  ;;  %p2879_p4 = scmp.lt.s32.totalorder %s30_s19, %s30_s19 }
   0xb   :  { %p2875_p3 = scmp.ne.s32.totalorder %s30_s19, %s2874_s27  ;;  %p2880_p5 = scmp.lt.s32.totalorder %s2874_s27, %s2874_s27 }
   0xd   :  { %p2881_p6 = por %p2880_p5, %p2879_p4 }
   0xf   :  { %p2882_p7 = pnand %p2881_p6, %p2875_p3 }
  0x11   :  { %2885 = shalt.err (!%p2882_p7)
}
  0x12   :  { %s2983_s28 = smov 640   ;;  %s2984_s29 = smov 40  }
  0x13   :  { %35 = dma.hbm_to_vmem [thread:$0]  %s3129_s1, 20480, %s30_s19, [#allocation6], %s2983_s28, %s2983_s28, %s2984_s29  }
  0x14   :  { %s2985_s7 = smov [#allocation2]   ;;  %s2986_s9 = smov [#allocation7]  }
  0x15   :  { %s20_s8 = sshll.u32 %s2985_s7, 4  ;;  %s42_s10 = sshll.u32 %s2986_s9, 4  ;;  %s21_s8 = int_to_ptr.vmem [resolvable:$true] %s20_s8  ;;  %s43_s10 = int_to_ptr.vmem [resolvable:$true] %s42_s10 }
  0x16   :  { %s2886_s13 = scalar_lea.hbm %s3128_s0, 32 }
  0x17   :  { %p2887_p8 = scmp.ne.s32.totalorder %s3128_s0, %s2886_s13  ;;  %p2890_p9 = scmp.lt.u32.totalorder %s2886_s13, %s3128_s0 }
  0x19   :  { %p2892_p10 = pnand %p2890_p9, %p2887_p8 }
  0x1b   :  { %2895 = shalt.err (!%p2892_p10)
}
  0x1c   :  { %s2896_s1 = scalar_lea.vmem %s21_s8, 32  ;;  %p2901_p12 = scmp.lt.s32.totalorder %s21_s8, %s21_s8 }
  0x1d   :  { %p2897_p11 = scmp.ne.s32.totalorder %s21_s8, %s2896_s1  ;;  %p2902_p13 = scmp.lt.s32.totalorder %s2896_s1, %s2896_s1 }
  0x1f   :  { %p2903_p0 = por %p2902_p13, %p2901_p12 }
  0x21   :  { %p2904_p1 = pnand %p2903_p0, %p2897_p11 }
  0x23   :  { %2907 = shalt.err (!%p2904_p1)
}
  0x24   :  { %23 = dma.hbm_to_vmem [thread:$0]  %s3128_s0, 32, %s21_s8, [#allocation3]  }
  0x25   :  { %s2908_s22 = scalar_lea.hbm %s3130_s2, 160 }
  0x26   :  { %p2909_p2 = scmp.ne.s32.totalorder %s3130_s2, %s2908_s22  ;;  %p2912_p3 = scmp.lt.u32.totalorder %s2908_s22, %s3130_s2 }
  0x28   :  { %p2914_p4 = pnand %p2912_p3, %p2909_p2 }
  0x2a   :  { %2917 = shalt.err (!%p2914_p4)
}
  0x2b   :  { %s2918_s27 = scalar_lea.vmem %s43_s10, 160  ;;  %p2923_p6 = scmp.lt.s32.totalorder %s43_s10, %s43_s10 }
  0x2c   :  { %p2919_p5 = scmp.ne.s32.totalorder %s43_s10, %s2918_s27  ;;  %p2924_p7 = scmp.lt.s32.totalorder %s2918_s27, %s2918_s27 }
  0x2e   :  { %p2925_p8 = por %p2924_p7, %p2923_p6 }
  0x30   :  { %p2926_p9 = pnand %p2925_p8, %p2919_p5 }
  0x32   :  { %2929 = shalt.err (!%p2926_p9)
}
  0x33   :  { %45 = dma.hbm_to_vmem [thread:$0]  %s3130_s2, 160, %s43_s10, [#allocation6]  }
  0x34   :  { %s2987_s29 = smov [#allocation8]   ;;  %s2930_s8 = scalar_lea.hbm %s3131_s3, 10240 }
  0x35   :  { %s51_s30 = sshll.u32 %s2987_s29, 4  ;;  %p2931_p10 = scmp.ne.s32.totalorder %s3131_s3, %s2930_s8  ;;  %s52_s30 = int_to_ptr.vmem [resolvable:$true] %s51_s30 }
  0x36   :  { %p2934_p11 = scmp.lt.u32.totalorder %s2930_s8, %s3131_s3 }
  0x38   :  { %p2936_p12 = pnand %p2934_p11, %p2931_p10 }
  0x3a   :  { %2939 = shalt.err (!%p2936_p12)
}
  0x3b   :  { %s2940_s14 = scalar_lea.vmem %s52_s30, 10240  ;;  %p2945_p0 = scmp.lt.s32.totalorder %s52_s30, %s52_s30 }
  0x3c   :  { %p2941_p13 = scmp.ne.s32.totalorder %s52_s30, %s2940_s14  ;;  %p2946_p1 = scmp.lt.s32.totalorder %s2940_s14, %s2940_s14 }
  0x3e   :  { %p2947_p2 = por %p2946_p1, %p2945_p0 }
  0x40   :  { %p2948_p3 = pnand %p2947_p2, %p2941_p13 }
  0x42   :  { %2951 = shalt.err (!%p2948_p3)
}
  0x43   :  { %s2988_s2 = smov 64   ;;  %s2989_s10 = smov 4  }
  0x44   :  { %57 = dma.hbm_to_vmem [thread:$0]  %s3131_s3, 10240, %s52_s30, [#allocation9], %s2988_s2, %s2988_s2, %s2989_s10  }
  0x45   :  { %2974 = dma.done.wait [#allocation3], 32  }
  0x46   :  { %2975 = vsyncadd [#allocation3], 4294967264 }
  0x47   :  { %2976 = dma.done.wait [#allocation6], 20640  }
  0x48   :  { %2977 = vsyncadd [#allocation6], 4294946656 }
  0x49   :  { %2978 = dma.done.wait [#allocation9], 10240  }
  0x4a   :  { %2979 = vsyncadd [#allocation9], 4294957056  ;;  %v2544_v0 = vld [vmem:[#allocation5 + $0x4] ss:$40 sps:$4 sm:$0xff]   ;;  %v2546_v1 = vld [vmem:[#allocation5] ss:$40 sps:$4 sm:$0xff]   ;;  %v75_v35 = vlaneseq }
  0x4b   :  { %1101 = vmatprep.subr.bf16.mxu0 %v2544_v0  ;;  %v2547_v2 = vld [vmem:[#allocation5 + $0xc] ss:$40 sps:$4 sm:$0xff]   ;;  %v2549_v3 = vld [vmem:[#allocation5 + $0x8] ss:$40 sps:$4 sm:$0xff]   ;;  %v2553_v6 = vld [vmem:[#allocation5 + $0x5c] ss:$40 sps:$4 sm:$0xff]  }
  0x4c   :  { %1102 = vmatpush1.bf16.msra.mxu0 %v2546_v1  ;;  %v2550_v4 = vld [vmem:[#allocation5 + $0x54] ss:$40 sps:$4 sm:$0xff]   ;;  %v2552_v5 = vld [vmem:[#allocation5 + $0x50] ss:$40 sps:$4 sm:$0xff]   ;;  %1142 = vmatprep.subr.bf16.mxu1 %v2547_v2  ;;  %v2556_v8 = vld [vmem:[#allocation5 + $0xa4] ss:$40 sps:$4 sm:$0xff]  }
  0x4d   :  { %1143 = vmatpush1.bf16.msra.mxu1 %v2549_v3  ;;  %1103 = vmatprep.subr.bf16.mxu0 %v2550_v4  ;;  %v2555_v7 = vld [vmem:[#allocation5 + $0x58] ss:$40 sps:$4 sm:$0xff]   ;;  %v2559_v10 = vld [vmem:[#allocation5 + $0xac] ss:$40 sps:$4 sm:$0xff]   ;;  %v2561_v12 = vld [vmem:[#allocation5 + $0xa8] ss:$40 sps:$4 sm:$0xff]  }
  0x4e   :  { %1144 = vmatprep.subr.bf16.mxu1 %v2553_v6  ;;  %v2558_v9 = vld [vmem:[#allocation5 + $0xa0] ss:$40 sps:$4 sm:$0xff]   ;;  %v2562_v11 = vld [vmem:[#allocation5 + $0xf4] ss:$40 sps:$4 sm:$0xff]   ;;  %v2564_v14 = vld [vmem:[#allocation5 + $0xf0] ss:$40 sps:$4 sm:$0xff]  }
  0x4f   :  { %v2565_v13 = vld [vmem:[#allocation5 + $0xfc] ss:$40 sps:$4 sm:$0xff]   ;;  %v2567_v16 = vld [vmem:[#allocation5 + $0xf8] ss:$40 sps:$4 sm:$0xff]   ;;  %v2571_v17 = vld [vmem:[#allocation5 + $0x14c] ss:$40 sps:$4 sm:$0xff]  }
  0x50   :  { %1104 = vmatpush1.bf16.msra.mxu0 %v2552_v5  ;;  %v2568_v15 = vld [vmem:[#allocation5 + $0x144] ss:$40 sps:$4 sm:$0xff]   ;;  %v2570_v18 = vld [vmem:[#allocation5 + $0x140] ss:$40 sps:$4 sm:$0xff]   ;;  %v2574_v19 = vld [vmem:[#allocation5 + $0x194] ss:$40 sps:$4 sm:$0xff]  }
  0x51   :  { %1105 = vmatprep.subr.bf16.mxu0 %v2556_v8  ;;  %1145 = vmatpush1.bf16.msra.mxu1 %v2555_v7  ;;  %v2573_v20 = vld [vmem:[#allocation5 + $0x148] ss:$40 sps:$4 sm:$0xff]   ;;  %v2577_v21 = vld [vmem:[#allocation5 + $0x19c] ss:$40 sps:$4 sm:$0xff]   ;;  %v2579_v24 = vld [vmem:[#allocation5 + $0x198] ss:$40 sps:$4 sm:$0xff]  }
  0x52   :  { %1146 = vmatprep.subr.bf16.mxu1 %v2559_v10  ;;  %v2576_v22 = vld [vmem:[#allocation5 + $0x190] ss:$40 sps:$4 sm:$0xff]   ;;  %v2580_v23 = vld [vmem:[#allocation5 + $0x1e4] ss:$40 sps:$4 sm:$0xff]   ;;  %v2582_v26 = vld [vmem:[#allocation5 + $0x1e0] ss:$40 sps:$4 sm:$0xff]  }
  0x53   :  { %v2583_v25 = vld [vmem:[#allocation5 + $0x1ec] ss:$40 sps:$4 sm:$0xff]   ;;  %v2585_v28 = vld [vmem:[#allocation5 + $0x1e8] ss:$40 sps:$4 sm:$0xff]   ;;  %v2589_v29 = vld [vmem:[#allocation5 + $0x23c] ss:$40 sps:$4 sm:$0xff]  }
  0x54   :  { %1106 = vmatpush1.bf16.msra.mxu0 %v2558_v9  ;;  %v2586_v27 = vld [vmem:[#allocation5 + $0x234] ss:$40 sps:$4 sm:$0xff]   ;;  %v2588_v30 = vld [vmem:[#allocation5 + $0x230] ss:$40 sps:$4 sm:$0xff]   ;;  %v2592_v31 = vld [vmem:[#allocation5 + $0x284] ss:$40 sps:$4 sm:$0xff]  }
  0x55   :  { %1107 = vmatprep.subr.bf16.mxu0 %v2562_v11  ;;  %1147 = vmatpush1.bf16.msra.mxu1 %v2561_v12  ;;  %v2591_v32 = vld [vmem:[#allocation5 + $0x238] ss:$40 sps:$4 sm:$0xff]   ;;  %v2595_v33 = vld [vmem:[#allocation5 + $0x28c] ss:$40 sps:$4 sm:$0xff]   ;;  %v2597_v37 = vld [vmem:[#allocation5 + $0x288] ss:$40 sps:$4 sm:$0xff]  }
  0x56   :  { %1148 = vmatprep.subr.bf16.mxu1 %v2565_v13  ;;  %v2594_v34 = vld [vmem:[#allocation5 + $0x280] ss:$40 sps:$4 sm:$0xff]   ;;  %v2598_v36 = vld [vmem:[#allocation5 + $0x2d4] ss:$40 sps:$4 sm:$0xff]   ;;  %v2600_v39 = vld [vmem:[#allocation5 + $0x2d0] ss:$40 sps:$4 sm:$0xff]  }
  0x57   :  { %v2601_v38 = vld [vmem:[#allocation5 + $0x2dc] ss:$40 sps:$4 sm:$0xff]   ;;  %v3069_v40 = vshrl.u32 %v75_v35, 7  ;;  %v2603_v42 = vld [vmem:[#allocation5 + $0x2d8] ss:$40 sps:$4 sm:$0xff]  }
  0x58   :  { %1108 = vmatpush1.bf16.msra.mxu0 %v2564_v14  ;;  %v2604_v41 = vld [vmem:[#allocation5 + $0x324] ss:$40 sps:$4 sm:$0xff]   ;;  %v2606_v44 = vld [vmem:[#allocation5 + $0x320] ss:$40 sps:$4 sm:$0xff]   ;;  %v2610_v46 = vld [vmem:[#allocation5 + $0x374] ss:$40 sps:$4 sm:$0xff]  }
  0x59   :  { %1109 = vmatprep.subr.bf16.mxu0 %v2568_v15  ;;  %1149 = vmatpush1.bf16.msra.mxu1 %v2567_v16  ;;  %v2607_v43 = vld [vmem:[#allocation5 + $0x32c] ss:$40 sps:$4 sm:$0xff]   ;;  %v3072_v45 = vsub.s32 1, %v3069_v40  ;;  %v2609_v47 = vld [vmem:[#allocation5 + $0x328] ss:$40 sps:$4 sm:$0xff]   ;;  %v3080_v0 = vsub.s32 0, %v3069_v40 }
  0x5a   :  { %1150 = vmatprep.subr.bf16.mxu1 %v2571_v17  ;;  %v2613_v48 = vld [vmem:[#allocation5 + $0x37c] ss:$40 sps:$4 sm:$0xff]   ;;  %v2612_v50 = vld [vmem:[#allocation5 + $0x370] ss:$40 sps:$4 sm:$0xff]   ;;  %v2619_v55 = vld [vmem:[#allocation5 + $0x3cc] ss:$40 sps:$4 sm:$0xff]  }
  0x5b   :  { %v73_v49 = vld [vmem:[#allocation2] sm:$0x3]  ;;  %v2616_v52 = vld [vmem:[#allocation5 + $0x3c4] ss:$40 sps:$4 sm:$0xff]   ;;  %v2615_v53 = vld [vmem:[#allocation5 + $0x378] ss:$40 sps:$4 sm:$0xff]  }
  0x5c   :  { %1110 = vmatpush1.bf16.msra.mxu0 %v2570_v18  ;;  %v82_v51 = vrot.slane %v73_v49, %v3072_v45  ;;  %v2618_v56 = vld [vmem:[#allocation5 + $0x3c0] ss:$40 sps:$4 sm:$0xff]   ;;  %v2622_v57 = vld [vmem:[#allocation5 + $0x414] ss:$40 sps:$4 sm:$0xff]   ;;  %v2624_v60 = vld [vmem:[#allocation5 + $0x410] ss:$40 sps:$4 sm:$0xff]   ;;  %v78_v5 = vrot.slane %v73_v49, %v3080_v0 }
  0x5d   :  { %1111 = vmatprep.subr.bf16.mxu0 %v2574_v19  ;;  %1151 = vmatpush1.bf16.msra.mxu1 %v2573_v20  ;;  %v2621_v58 = vld [vmem:[#allocation5 + $0x3c8] ss:$40 sps:$4 sm:$0xff]   ;;  %v2625_v59 = vld [vmem:[#allocation5 + $0x41c] ss:$40 sps:$4 sm:$0xff]   ;;  %v2627_v62 = vld [vmem:[#allocation5 + $0x418] ss:$40 sps:$4 sm:$0xff]  }
  0x5e   :  { %1152 = vmatprep.subr.bf16.mxu1 %v2577_v21  ;;  %v3075_v54 = vpack.c.bf16 %v82_v51, %v82_v51  ;;  %v2628_v61 = vld [vmem:[#allocation5 + $0x464] ss:$40 sps:$4 sm:$0xff]   ;;  %v2630_v1 = vld [vmem:[#allocation5 + $0x460] ss:$40 sps:$4 sm:$0xff]   ;;  %v2634_v2 = vld [vmem:[#allocation5 + $0x4b4] ss:$40 sps:$4 sm:$0xff]   ;;  %v3083_v9 = vpack.c.bf16 %v78_v5, %v78_v5 }
  0x5f   :  { %v2631_v63 = vld [vmem:[#allocation5 + $0x46c] ss:$40 sps:$4 sm:$0xff]   ;;  %v2633_v3 = vld [vmem:[#allocation5 + $0x468] ss:$40 sps:$4 sm:$0xff]   ;;  %v2637_v4 = vld [vmem:[#allocation5 + $0x4bc] ss:$40 sps:$4 sm:$0xff]  }
  0x60   :  { %1112 = vmatpush1.bf16.msra.mxu0 %v2576_v22  ;;  %1133 = vmatprep.mubr.bf16.mxu0 %v3075_v54  ;;  %v2636_v6 = vld [vmem:[#allocation5 + $0x4b0] ss:$40 sps:$4 sm:$0xff]   ;;  %v2642_v7 = vld [vmem:[#allocation5 + $0x14] ss:$40 sps:$4 sm:$0xff]   ;;  %v2648_v12 = vld [vmem:[#allocation5 + $0x64] ss:$40 sps:$4 sm:$0xff]  }
  0x61   :  { %1113 = vmatprep.subr.bf16.mxu0 %v2580_v23  ;;  %1153 = vmatpush1.bf16.msra.mxu1 %v2579_v24  ;;  %v2639_v8 = vld [vmem:[#allocation5 + $0x4b8] ss:$40 sps:$4 sm:$0xff]   ;;  %v2645_v10 = vld [vmem:[#allocation5 + $0x1c] ss:$40 sps:$4 sm:$0xff]   ;;  %v2651_v14 = vld [vmem:[#allocation5 + $0x6c] ss:$40 sps:$4 sm:$0xff]  }
  0x62   :  { %1154 = vmatprep.subr.bf16.mxu1 %v2583_v25  ;;  %1174 = vmatprep.mubr.bf16.mxu1 %v3075_v54  ;;  %v2640_v11 = vld [vmem:[#allocation5 + $0x10] ss:$40 sps:$4 sm:$0xff]   ;;  %v2646_v15 = vld [vmem:[#allocation5 + $0x60] ss:$40 sps:$4 sm:$0xff]   ;;  %v2654_v16 = vld [vmem:[#allocation5 + $0xb4] ss:$40 sps:$4 sm:$0xff]  }
  0x63   :  { %v2643_v13 = vld [vmem:[#allocation5 + $0x18] ss:$40 sps:$4 sm:$0xff]   ;;  %v2649_v17 = vld [vmem:[#allocation5 + $0x68] ss:$40 sps:$4 sm:$0xff]   ;;  %v2657_v18 = vld [vmem:[#allocation5 + $0xbc] ss:$40 sps:$4 sm:$0xff]  }
  0x64   :  { %1114 = vmatpush1.bf16.msra.mxu0 %v2582_v26  ;;  %v2652_v19 = vld [vmem:[#allocation5 + $0xb0] ss:$40 sps:$4 sm:$0xff]   ;;  %v2660_v20 = vld [vmem:[#allocation5 + $0x104] ss:$40 sps:$4 sm:$0xff]   ;;  %v2658_v23 = vld [vmem:[#allocation5 + $0x100] ss:$40 sps:$4 sm:$0xff]  }
  0x65   :  { %1115 = vmatprep.subr.bf16.mxu0 %v2586_v27  ;;  %1155 = vmatpush1.bf16.msra.mxu1 %v2585_v28  ;;  %v2655_v21 = vld [vmem:[#allocation5 + $0xb8] ss:$40 sps:$4 sm:$0xff]   ;;  %v2663_v22 = vld [vmem:[#allocation5 + $0x10c] ss:$40 sps:$4 sm:$0xff]   ;;  %v2661_v25 = vld [vmem:[#allocation5 + $0x108] ss:$40 sps:$4 sm:$0xff]  }
  0x66   :  { %1156 = vmatprep.subr.bf16.mxu1 %v2589_v29  ;;  %v2666_v24 = vld [vmem:[#allocation5 + $0x154] ss:$40 sps:$4 sm:$0xff]   ;;  %v2664_v27 = vld [vmem:[#allocation5 + $0x150] ss:$40 sps:$4 sm:$0xff]   ;;  %v2672_v28 = vld [vmem:[#allocation5 + $0x1a4] ss:$40 sps:$4 sm:$0xff]  }
  0x67   :  { %v2669_v26 = vld [vmem:[#allocation5 + $0x15c] ss:$40 sps:$4 sm:$0xff]   ;;  %v2667_v29 = vld [vmem:[#allocation5 + $0x158] ss:$40 sps:$4 sm:$0xff]   ;;  %v2697_v51 = vld [vmem:[#allocation5 + $0x2e8] ss:$40 sps:$4 sm:$0xff]  }
  0x68   :  { %1116 = vmatpush1.bf16.msra.mxu0 %v2588_v30  ;;  %v2675_v30 = vld [vmem:[#allocation5 + $0x1ac] ss:$40 sps:$4 sm:$0xff]   ;;  %v2676_v35 = vld [vmem:[#allocation5 + $0x1f0] ss:$40 sps:$4 sm:$0xff]   ;;  %v2694_v49 = vld [vmem:[#allocation5 + $0x2e0] ss:$40 sps:$4 sm:$0xff]  }
  0x69   :  { %1117 = vmatprep.subr.bf16.mxu0 %v2592_v31  ;;  %1157 = vmatpush1.bf16.msra.mxu1 %v2591_v32  ;;  %v2670_v31 = vld [vmem:[#allocation5 + $0x1a0] ss:$40 sps:$4 sm:$0xff]   ;;  %v2678_v32 = vld [vmem:[#allocation5 + $0x1f4] ss:$40 sps:$4 sm:$0xff]  }
  0x6a   :  { %1158 = vmatprep.subr.bf16.mxu1 %v2595_v33  ;;  %v2673_v33 = vld [vmem:[#allocation5 + $0x1a8] ss:$40 sps:$4 sm:$0xff]   ;;  %v2726_v5 = vld [vmem:[#allocation5 + $0x474] ss:$40 sps:$4 sm:$0xff]  }
  0x6c   :  { %1118 = vmatpush1.bf16.msra.mxu0 %v2594_v34  ;;  %v2681_v34 = vld [vmem:[#allocation5 + $0x1fc] ss:$40 sps:$4 sm:$0xff]  }
  0x6d   :  { %1119 = vmatprep.subr.bf16.mxu0 %v2598_v36  ;;  %1159 = vmatpush1.bf16.msra.mxu1 %v2597_v37  ;;  %v2684_v36 = vld [vmem:[#allocation5 + $0x244] ss:$40 sps:$4 sm:$0xff]   ;;  %v2679_v37 = vld [vmem:[#allocation5 + $0x1f8] ss:$40 sps:$4 sm:$0xff]  }
  0x6e   :  { %1160 = vmatprep.subr.bf16.mxu1 %v2601_v38  ;;  %v2687_v38 = vld [vmem:[#allocation5 + $0x24c] ss:$40 sps:$4 sm:$0xff]  }
  0x70   :  { %1120 = vmatpush1.bf16.msra.mxu0 %v2600_v39  ;;  %v2682_v39 = vld [vmem:[#allocation5 + $0x240] ss:$40 sps:$4 sm:$0xff]  }
  0x71   :  { %1121 = vmatprep.subr.bf16.mxu0 %v2604_v41  ;;  %1161 = vmatpush1.bf16.msra.mxu1 %v2603_v42  ;;  %v2690_v41 = vld [vmem:[#allocation5 + $0x294] ss:$40 sps:$4 sm:$0xff]   ;;  %v2685_v42 = vld [vmem:[#allocation5 + $0x248] ss:$40 sps:$4 sm:$0xff]  }
  0x72   :  { %1162 = vmatprep.subr.bf16.mxu1 %v2607_v43  ;;  %v2693_v43 = vld [vmem:[#allocation5 + $0x29c] ss:$40 sps:$4 sm:$0xff]  }
  0x74   :  { %1122 = vmatpush1.bf16.msra.mxu0 %v2606_v44  ;;  %v2688_v44 = vld [vmem:[#allocation5 + $0x290] ss:$40 sps:$4 sm:$0xff]  }
  0x75   :  { %1123 = vmatprep.subr.bf16.mxu0 %v2610_v46  ;;  %1163 = vmatpush1.bf16.msra.mxu1 %v2609_v47  ;;  %v2696_v46 = vld [vmem:[#allocation5 + $0x2e4] ss:$40 sps:$4 sm:$0xff]   ;;  %v2691_v47 = vld [vmem:[#allocation5 + $0x298] ss:$40 sps:$4 sm:$0xff]  }
  0x76   :  { %1164 = vmatprep.subr.bf16.mxu1 %v2613_v48  ;;  %v2699_v48 = vld [vmem:[#allocation5 + $0x2ec] ss:$40 sps:$4 sm:$0xff]  }
  0x78   :  { %1124 = vmatpush1.bf16.msra.mxu0 %v2612_v50  ;;  %v2702_v50 = vld [vmem:[#allocation5 + $0x334] ss:$40 sps:$4 sm:$0xff]  }
  0x79   :  { %1125 = vmatprep.subr.bf16.mxu0 %v2616_v52  ;;  %1165 = vmatpush1.bf16.msra.mxu1 %v2615_v53  ;;  %v2705_v52 = vld [vmem:[#allocation5 + $0x33c] ss:$40 sps:$4 sm:$0xff]   ;;  %v2700_v53 = vld [vmem:[#allocation5 + $0x330] ss:$40 sps:$4 sm:$0xff]  }
  0x7a   :  { %1166 = vmatprep.subr.bf16.mxu1 %v2619_v55  ;;  %v2708_v55 = vld [vmem:[#allocation5 + $0x384] ss:$40 sps:$4 sm:$0xff]  }
  0x7c   :  { %1126 = vmatpush1.bf16.msra.mxu0 %v2618_v56  ;;  %v2703_v56 = vld [vmem:[#allocation5 + $0x338] ss:$40 sps:$4 sm:$0xff]  }
  0x7d   :  { %1127 = vmatprep.subr.bf16.mxu0 %v2622_v57  ;;  %1167 = vmatpush1.bf16.msra.mxu1 %v2621_v58  ;;  %v2706_v57 = vld [vmem:[#allocation5 + $0x380] ss:$40 sps:$4 sm:$0xff]   ;;  %v2711_v58 = vld [vmem:[#allocation5 + $0x38c] ss:$40 sps:$4 sm:$0xff]  }
  0x7e   :  { %1168 = vmatprep.subr.bf16.mxu1 %v2625_v59  ;;  %v2709_v59 = vld [vmem:[#allocation5 + $0x388] ss:$40 sps:$4 sm:$0xff]  }
  0x80   :  { %1128 = vmatpush1.bf16.msra.mxu0 %v2624_v60  ;;  %v2714_v60 = vld [vmem:[#allocation5 + $0x3d4] ss:$40 sps:$4 sm:$0xff]  }
  0x81   :  { %1129 = vmatprep.subr.bf16.mxu0 %v2628_v61  ;;  %1169 = vmatpush1.bf16.msra.mxu1 %v2627_v62  ;;  %v2712_v61 = vld [vmem:[#allocation5 + $0x3d0] ss:$40 sps:$4 sm:$0xff]   ;;  %v2717_v62 = vld [vmem:[#allocation5 + $0x3dc] ss:$40 sps:$4 sm:$0xff]  }
  0x82   :  { %1170 = vmatprep.subr.bf16.mxu1 %v2631_v63  ;;  %v2715_v63 = vld [vmem:[#allocation5 + $0x3d8] ss:$40 sps:$4 sm:$0xff]  }
  0x84   :  { %1130 = vmatpush1.bf16.msra.mxu0 %v2630_v1  ;;  %v2720_v1 = vld [vmem:[#allocation5 + $0x424] ss:$40 sps:$4 sm:$0xff]  }
  0x85   :  { %1131 = vmatprep.subr.bf16.mxu0 %v2634_v2  ;;  %1171 = vmatpush1.bf16.msra.mxu1 %v2633_v3  ;;  %v2718_v2 = vld [vmem:[#allocation5 + $0x420] ss:$40 sps:$4 sm:$0xff]   ;;  %v2723_v3 = vld [vmem:[#allocation5 + $0x42c] ss:$40 sps:$4 sm:$0xff]  }
  0x86   :  { %1172 = vmatprep.subr.bf16.mxu1 %v2637_v4  ;;  %v2721_v4 = vld [vmem:[#allocation5 + $0x428] ss:$40 sps:$4 sm:$0xff]  }
  0x88   :  { %1132 = vmatpush1.bf16.msra.mxu0 %v2636_v6  ;;  %v2724_v6 = vld [vmem:[#allocation5 + $0x470] ss:$40 sps:$4 sm:$0xff]  }
  0x89   :  { %1183 = vmatprep.subr.bf16.mxu0 %v2642_v7  ;;  %1173 = vmatpush1.bf16.msra.mxu1 %v2639_v8  ;;  %v2729_v7 = vld [vmem:[#allocation5 + $0x47c] ss:$40 sps:$4 sm:$0xff]   ;;  %v2727_v8 = vld [vmem:[#allocation5 + $0x478] ss:$40 sps:$4 sm:$0xff]  }
  0x8a   :  { %1224 = vmatprep.subr.bf16.mxu1 %v2645_v10  ;;  %v2732_v10 = vld [vmem:[#allocation5 + $0x4c4] ss:$40 sps:$4 sm:$0xff]  }
  0x8b   :  { %1134 = vmatmul.mubr.bf16.vlgmr.msra.gmra.mrb[0].mxu0 %v3083_v9 }
  0x8c   :  { %1184 = vmatpush1.bf16.msra.mxu0 %v2640_v11  ;;  %1215 = vmatprep.mubr.bf16.mxu0 %v3075_v54  ;;  %v2735_v11 = vld [vmem:[#allocation5 + $0x4cc] ss:$40 sps:$4 sm:$0xff]  }
  0x8d   :  { %1175 = vmatmul.mubr.bf16.vlgmr.msra.gmra.mrb[0].mxu1 %v3083_v9  ;;  %1185 = vmatprep.subr.bf16.mxu0 %v2648_v12  ;;  %v2730_v12 = vld [vmem:[#allocation5 + $0x4c0] ss:$40 sps:$4 sm:$0xff]  }
  0x8e   :  { %1225 = vmatpush1.bf16.msra.mxu1 %v2643_v13  ;;  %1256 = vmatprep.mubr.bf16.mxu1 %v3075_v54  ;;  %v2738_v13 = vld [vmem:[#allocation5 + $0x24] ss:$40 sps:$4 sm:$0xff]  }
  0x8f   :  { %1226 = vmatprep.subr.bf16.mxu1 %v2651_v14  ;;  %v2733_v14 = vld [vmem:[#allocation5 + $0x4c8] ss:$40 sps:$4 sm:$0xff]  }
  0x90   :  { %1186 = vmatpush1.bf16.msra.mxu0 %v2646_v15  ;;  %v2784_v15 = vld [vmem:[#allocation8 + $0x40] sm:$0xff]  }
  0x91   :  { %1187 = vmatprep.subr.bf16.mxu0 %v2654_v16  ;;  %v2736_v16 = vld [vmem:[#allocation5 + $0x20] ss:$40 sps:$4 sm:$0xff]  }
  0x92   :  { %1227 = vmatpush1.bf16.msra.mxu1 %v2649_v17  ;;  %v2741_v17 = vld [vmem:[#allocation5 + $0x74] ss:$40 sps:$4 sm:$0xff]  }
  0x93   :  { %1228 = vmatprep.subr.bf16.mxu1 %v2657_v18  ;;  %v2785_v18 = vld [vmem:[#allocation8] sm:$0xff]  }
  0x94   :  { %1188 = vmatpush1.bf16.msra.mxu0 %v2652_v19  ;;  %v2786_v19 = vld [vmem:[#allocation8 + $0x48] sm:$0xff]  }
  0x95   :  { %1189 = vmatprep.subr.bf16.mxu0 %v2660_v20  ;;  %v2739_v20 = vld [vmem:[#allocation5 + $0x70] ss:$40 sps:$4 sm:$0xff]  }
  0x96   :  { %1229 = vmatpush1.bf16.msra.mxu1 %v2655_v21  ;;  %v2744_v21 = vld [vmem:[#allocation5 + $0xc4] ss:$40 sps:$4 sm:$0xff]  }
  0x97   :  { %1230 = vmatprep.subr.bf16.mxu1 %v2663_v22  ;;  %v2787_v22 = vld [vmem:[#allocation8 + $0x8] sm:$0xff]  }
  0x98   :  { %1190 = vmatpush1.bf16.msra.mxu0 %v2658_v23  ;;  %v2788_v23 = vld [vmem:[#allocation8 + $0x50] sm:$0xff]  }
  0x99   :  { %1191 = vmatprep.subr.bf16.mxu0 %v2666_v24  ;;  %v2742_v24 = vld [vmem:[#allocation5 + $0xc0] ss:$40 sps:$4 sm:$0xff]  }
  0x9a   :  { %1231 = vmatpush1.bf16.msra.mxu1 %v2661_v25  ;;  %v2747_v25 = vld [vmem:[#allocation5 + $0x114] ss:$40 sps:$4 sm:$0xff]  }
  0x9b   :  { %1232 = vmatprep.subr.bf16.mxu1 %v2669_v26  ;;  %v2789_v26 = vld [vmem:[#allocation8 + $0x10] sm:$0xff]  }
  0x9c   :  { %1192 = vmatpush1.bf16.msra.mxu0 %v2664_v27  ;;  %v2790_v27 = vld [vmem:[#allocation8 + $0x58] sm:$0xff]  }
  0x9d   :  { %1193 = vmatprep.subr.bf16.mxu0 %v2672_v28  ;;  %v2745_v28 = vld [vmem:[#allocation5 + $0x110] ss:$40 sps:$4 sm:$0xff]  }
  0x9e   :  { %1233 = vmatpush1.bf16.msra.mxu1 %v2667_v29  ;;  %v2750_v29 = vld [vmem:[#allocation5 + $0x164] ss:$40 sps:$4 sm:$0xff]  }
  0x9f   :  { %1234 = vmatprep.subr.bf16.mxu1 %v2675_v30  ;;  %v2791_v30 = vld [vmem:[#allocation8 + $0x18] sm:$0xff]  }
  0xa0   :  { %1194 = vmatpush1.bf16.msra.mxu0 %v2670_v31  ;;  %v2748_v31 = vld [vmem:[#allocation5 + $0x160] ss:$40 sps:$4 sm:$0xff]  }
  0xa1   :  { %1195 = vmatprep.subr.bf16.mxu0 %v2678_v32  ;;  %v2753_v32 = vld [vmem:[#allocation5 + $0x1b4] ss:$40 sps:$4 sm:$0xff]  }
  0xa2   :  { %1235 = vmatpush1.bf16.msra.mxu1 %v2673_v33  ;;  %v2793_v33 = vld [vmem:[#allocation8 + $0x20] sm:$0xff]  }
  0xa3   :  { %1236 = vmatprep.subr.bf16.mxu1 %v2681_v34  ;;  %v2794_v34 = vld [vmem:[#allocation8 + $0x68] sm:$0xff]  }
  0xa4   :  { %1196 = vmatpush1.bf16.msra.mxu0 %v2676_v35  ;;  %v2751_v35 = vld [vmem:[#allocation5 + $0x1b0] ss:$40 sps:$4 sm:$0xff]  }
  0xa5   :  { %1197 = vmatprep.subr.bf16.mxu0 %v2684_v36  ;;  %v2756_v36 = vld [vmem:[#allocation5 + $0x204] ss:$40 sps:$4 sm:$0xff]  }
  0xa6   :  { %1237 = vmatpush1.bf16.msra.mxu1 %v2679_v37  ;;  %v2795_v37 = vld [vmem:[#allocation8 + $0x28] sm:$0xff]  }
  0xa7   :  { %1238 = vmatprep.subr.bf16.mxu1 %v2687_v38  ;;  %v2796_v38 = vld [vmem:[#allocation8 + $0x70] sm:$0xff]  }
  0xa8   :  { %1198 = vmatpush1.bf16.msra.mxu0 %v2682_v39  ;;  %v2754_v39 = vld [vmem:[#allocation5 + $0x200] ss:$40 sps:$4 sm:$0xff]  }
  0xa9   :  { %1199 = vmatprep.subr.bf16.mxu0 %v2690_v41  ;;  %v2759_v41 = vld [vmem:[#allocation5 + $0x254] ss:$40 sps:$4 sm:$0xff]  }
  0xaa   :  { %1239 = vmatpush1.bf16.msra.mxu1 %v2685_v42  ;;  %v2797_v42 = vld [vmem:[#allocation8 + $0x30] sm:$0xff]  }
  0xab   :  { %1240 = vmatprep.subr.bf16.mxu1 %v2693_v43  ;;  %v2798_v43 = vld [vmem:[#allocation8 + $0x78] sm:$0xff]  }
  0xac   :  { %1200 = vmatpush1.bf16.msra.mxu0 %v2688_v44  ;;  %v2757_v44 = vld [vmem:[#allocation5 + $0x250] ss:$40 sps:$4 sm:$0xff]  }
  0xad   :  { %1201 = vmatprep.subr.bf16.mxu0 %v2696_v46  ;;  %v2762_v46 = vld [vmem:[#allocation5 + $0x2a4] ss:$40 sps:$4 sm:$0xff]  }
  0xae   :  { %1241 = vmatpush1.bf16.msra.mxu1 %v2691_v47  ;;  %v2799_v47 = vld [vmem:[#allocation8 + $0x38] sm:$0xff]  }
  0xaf   :  { %1242 = vmatprep.subr.bf16.mxu1 %v2699_v48  ;;  %v2800_v48 = vld [vmem:[#allocation8 + $0xc0] sm:$0xff]  }
  0xb0   :  { %1202 = vmatpush1.bf16.msra.mxu0 %v2694_v49  ;;  %v2760_v49 = vld [vmem:[#allocation5 + $0x2a0] ss:$40 sps:$4 sm:$0xff]  }
  0xb1   :  { %1203 = vmatprep.subr.bf16.mxu0 %v2702_v50  ;;  %v2765_v50 = vld [vmem:[#allocation5 + $0x2f4] ss:$40 sps:$4 sm:$0xff]  }
  0xb2   :  { %1243 = vmatpush1.bf16.msra.mxu1 %v2697_v51  ;;  %v2763_v51 = vld [vmem:[#allocation5 + $0x2f0] ss:$40 sps:$4 sm:$0xff]  }
  0xb3   :  { %1244 = vmatprep.subr.bf16.mxu1 %v2705_v52  ;;  %v2768_v52 = vld [vmem:[#allocation5 + $0x344] ss:$40 sps:$4 sm:$0xff]  }
  0xb4   :  { %1204 = vmatpush1.bf16.msra.mxu0 %v2700_v53  ;;  %v2766_v53 = vld [vmem:[#allocation5 + $0x340] ss:$40 sps:$4 sm:$0xff]  }
  0xb5   :  { %1205 = vmatprep.subr.bf16.mxu0 %v2708_v55  ;;  %v2771_v55 = vld [vmem:[#allocation5 + $0x394] ss:$40 sps:$4 sm:$0xff]  }
  0xb6   :  { %1245 = vmatpush1.bf16.msra.mxu1 %v2703_v56  ;;  %v2769_v56 = vld [vmem:[#allocation5 + $0x390] ss:$40 sps:$4 sm:$0xff]  }
  0xb7   :  { %1246 = vmatprep.subr.bf16.mxu1 %v2711_v58  ;;  %v2772_v58 = vld [vmem:[#allocation5 + $0x3e0] ss:$40 sps:$4 sm:$0xff]  }
  0xb8   :  { %1206 = vmatpush1.bf16.msra.mxu0 %v2706_v57  ;;  %v2774_v57 = vld [vmem:[#allocation5 + $0x3e4] ss:$40 sps:$4 sm:$0xff]  }
  0xb9   :  { %1207 = vmatprep.subr.bf16.mxu0 %v2714_v60  ;;  %v2775_v60 = vld [vmem:[#allocation5 + $0x430] ss:$40 sps:$4 sm:$0xff]  }
  0xba   :  { %1247 = vmatpush1.bf16.msra.mxu1 %v2709_v59  ;;  %v2777_v59 = vld [vmem:[#allocation5 + $0x434] ss:$40 sps:$4 sm:$0xff]  }
  0xbb   :  { %1248 = vmatprep.subr.bf16.mxu1 %v2717_v62  ;;  %v2778_v62 = vld [vmem:[#allocation5 + $0x480] ss:$40 sps:$4 sm:$0xff]  }
  0xbc   :  { %1208 = vmatpush1.bf16.msra.mxu0 %v2712_v61  ;;  %v2780_v61 = vld [vmem:[#allocation5 + $0x484] ss:$40 sps:$4 sm:$0xff]  }
  0xbd   :  { %1209 = vmatprep.subr.bf16.mxu0 %v2720_v1  ;;  %v2781_v1 = vld [vmem:[#allocation5 + $0x4d0] ss:$40 sps:$4 sm:$0xff]  }
  0xbe   :  { %1249 = vmatpush1.bf16.msra.mxu1 %v2715_v63  ;;  %v2783_v63 = vld [vmem:[#allocation5 + $0x4d4] ss:$40 sps:$4 sm:$0xff]  }
  0xbf   :  { %1250 = vmatprep.subr.bf16.mxu1 %v2723_v3  ;;  %v2817_v3 = vld [vmem:[#allocation8 + $0x100] sm:$0xff]  }
  0xc0   :  { %1210 = vmatpush1.bf16.msra.mxu0 %v2718_v2  ;;  %v2816_v2 = vld [vmem:[#allocation8 + $0x140] sm:$0xff]  }
  0xc1   :  { %1211 = vmatprep.subr.bf16.mxu0 %v2726_v5  ;;  %v2821_v5 = vld [vmem:[#allocation8 + $0x108] sm:$0xff]  }
  0xc2   :  { %1251 = vmatpush1.bf16.msra.mxu1 %v2721_v4  ;;  %v2820_v4 = vld [vmem:[#allocation8 + $0x148] sm:$0xff]  }
  0xc3   :  { %1252 = vmatprep.subr.bf16.mxu1 %v2729_v7  ;;  %v2825_v7 = vld [vmem:[#allocation8 + $0x110] sm:$0xff]  }
  0xc4   :  { %1212 = vmatpush1.bf16.msra.mxu0 %v2724_v6  ;;  %v2824_v6 = vld [vmem:[#allocation8 + $0x150] sm:$0xff]  }
  0xc5   :  { %1213 = vmatprep.subr.bf16.mxu0 %v2732_v10  ;;  %v2829_v10 = vld [vmem:[#allocation8 + $0x118] sm:$0xff]  }
  0xc6   :  { %1253 = vmatpush1.bf16.msra.mxu1 %v2727_v8  ;;  %v2828_v8 = vld [vmem:[#allocation8 + $0x158] sm:$0xff]  }
  0xc7   :  { %1254 = vmatprep.subr.bf16.mxu1 %v2735_v11  ;;  %v2832_v11 = vld [vmem:[#allocation8 + $0x160] sm:$0xff]  }
  0xc8   :  { %1214 = vmatpush1.bf16.msra.mxu0 %v2730_v12  ;;  %v2833_v12 = vld [vmem:[#allocation8 + $0x120] sm:$0xff]  }
  0xc9   :  { %1265 = vmatprep.subr.bf16.mxu0 %v2738_v13  ;;  %v2836_v13 = vld [vmem:[#allocation8 + $0x168] sm:$0xff]  }
  0xca   :  { %1255 = vmatpush1.bf16.msra.mxu1 %v2733_v14  ;;  %v2837_v14 = vld [vmem:[#allocation8 + $0x128] sm:$0xff]  }
  0xcb   :  { %1216 = vmatmul.mubr.bf16.vlgmr.msra.gmra.mrb[4].mxu0 %v3083_v9  ;;  %2425 = vmatprep.subr.bf16.mxu1 %v2784_v15  ;;  %v2841_v15 = vld [vmem:[#allocation8 + $0x130] sm:$0xff]  }
  0xcc   :  { %1266 = vmatpush1.bf16.msra.mxu0 %v2736_v16  ;;  %1297 = vmatprep.mubr.bf16.mxu0 %v3075_v54  ;;  %v2792_v54 = vld [vmem:[#allocation8 + $0x60] sm:$0xff]   ;;  %v2844_v16 = vld [vmem:[#allocation8 + $0x178] sm:$0xff]  }
  0xcd   :  { %1257 = vmatmul.mubr.bf16.vlgmr.msra.gmra.mrb[4].mxu1 %v3083_v9  ;;  %1267 = vmatprep.subr.bf16.mxu0 %v2741_v17  ;;  %v2845_v17 = vld [vmem:[#allocation8 + $0x138] sm:$0xff]  }
  0xce   :  { %2426 = vmatpush3.bf16.msra.mxu1 %v2785_v18  ;;  %v2848_v18 = vld [vmem:[#allocation8 + $0x240] sm:$0xff]  }
  0xcf   :  { %2427 = vmatprep.subr.bf16.mxu1 %v2786_v19  ;;  %v3093_v19 = vld [vmem:[#allocation7] sm:$0xff] }
  0xd0   :  { %1268 = vmatpush1.bf16.msra.mxu0 %v2739_v20  ;;  %v1065_v20 = vsub.s32 3, %v3069_v40 }
  0xd1   :  { %1269 = vmatprep.subr.bf16.mxu0 %v2744_v21  ;;  %v1054_v21 = vrot.slane %v3093_v19, %v3080_v0 }
  0xd2   :  { %2428 = vmatpush3.bf16.msra.mxu1 %v2787_v22  ;;  %v1058_v22 = vrot.slane %v3093_v19, %v3072_v45 }
  0xd3   :  { %2429 = vmatprep.subr.bf16.mxu1 %v2788_v23 }
  0xd4   :  { %1270 = vmatpush1.bf16.msra.mxu0 %v2742_v24  ;;  %v1066_v24 = vrot.slane %v3093_v19, %v1065_v20  ;;  %v2843_v20 = vld [vmem:[#allocation8 + $0x1b0] sm:$0xff]  }
  0xd5   :  { %1271 = vmatprep.subr.bf16.mxu0 %v2747_v25 }
  0xd6   :  { %2430 = vmatpush3.bf16.msra.mxu1 %v2789_v26 }
  0xd7   :  { %2431 = vmatprep.subr.bf16.mxu1 %v2790_v27 }
  0xd8   :  { %1272 = vmatpush1.bf16.msra.mxu0 %v2745_v28 }
  0xd9   :  { %1273 = vmatprep.subr.bf16.mxu0 %v2750_v29 }
  0xda   :  { %2432 = vmatpush3.bf16.msra.mxu1 %v2791_v30 }
  0xdb   :  { %2433 = vmatprep.subr.bf16.mxu1 %v2792_v54 }
  0xdc   :  { %1274 = vmatpush1.bf16.msra.mxu0 %v2748_v31 }
  0xdd   :  { %1275 = vmatprep.subr.bf16.mxu0 %v2753_v32 }
  0xde   :  { %2434 = vmatpush3.bf16.msra.mxu1 %v2793_v33 }
  0xdf   :  { %2435 = vmatprep.subr.bf16.mxu1 %v2794_v34 }
  0xe0   :  { %1276 = vmatpush1.bf16.msra.mxu0 %v2751_v35 }
  0xe1   :  { %1277 = vmatprep.subr.bf16.mxu0 %v2756_v36 }
  0xe2   :  { %2436 = vmatpush3.bf16.msra.mxu1 %v2795_v37 }
  0xe3   :  { %2437 = vmatprep.subr.bf16.mxu1 %v2796_v38  ;;  %v2801_v38 = vld [vmem:[#allocation8 + $0x80] sm:$0xff]  }
  0xe4   :  { %1278 = vmatpush1.bf16.msra.mxu0 %v2754_v39 }
  0xe5   :  { %1279 = vmatprep.subr.bf16.mxu0 %v2759_v41  ;;  %v2802_v41 = vld [vmem:[#allocation8 + $0xc8] sm:$0xff]  }
  0xe6   :  { %2438 = vmatpush3.bf16.msra.mxu1 %v2797_v42 }
  0xe7   :  { %2439 = vmatprep.subr.bf16.mxu1 %v2798_v43  ;;  %v2803_v43 = vld [vmem:[#allocation8 + $0x88] sm:$0xff]  }
  0xe8   :  { %1280 = vmatpush1.bf16.msra.mxu0 %v2757_v44  ;;  %v2804_v44 = vld [vmem:[#allocation8 + $0xd0] sm:$0xff]  }
  0xe9   :  { %1281 = vmatprep.subr.bf16.mxu0 %v2762_v46  ;;  %v2805_v46 = vld [vmem:[#allocation8 + $0x90] sm:$0xff]  }
  0xea   :  { %2440 = vmatpush3.bf16.msra.mxu1 %v2799_v47  ;;  %v2806_v47 = vld [vmem:[#allocation8 + $0xd8] sm:$0xff]  }
  0xeb   :  { %2447 = vmatprep.subr.bf16.mxu1 %v2800_v48  ;;  %v2807_v48 = vld [vmem:[#allocation8 + $0x98] sm:$0xff]  }
  0xec   :  { %1282 = vmatpush1.bf16.msra.mxu0 %v2760_v49  ;;  %v2808_v49 = vld [vmem:[#allocation8 + $0xe0] sm:$0xff]  }
  0xed   :  { %1283 = vmatprep.subr.bf16.mxu0 %v2765_v50  ;;  %v1061_v50 = vsub.s32 2, %v3069_v40 }
  0xf0   :  { %1284 = vmatpush1.bf16.msra.mxu0 %v2763_v51  ;;  %v2809_v51 = vld [vmem:[#allocation8 + $0xa0] sm:$0xff]  }
  0xf1   :  { %1285 = vmatprep.subr.bf16.mxu0 %v2768_v52  ;;  %v2810_v52 = vld [vmem:[#allocation8 + $0xe8] sm:$0xff]  }
  0xf4   :  { %1286 = vmatpush1.bf16.msra.mxu0 %v2766_v53  ;;  %v1062_v53 = vrot.slane %v3093_v19, %v1061_v50  ;;  %v2855_v50 = vld [vmem:[#allocation8 + $0x218] sm:$0xff]  }
  0xf5   :  { %1287 = vmatprep.subr.bf16.mxu0 %v2771_v55  ;;  %v2811_v55 = vld [vmem:[#allocation8 + $0xa8] sm:$0xff]  }
  0xf8   :  { %1288 = vmatpush1.bf16.msra.mxu0 %v2769_v56  ;;  %v2812_v56 = vld [vmem:[#allocation8 + $0xf0] sm:$0xff]  }
  0xf9   :  { %1289 = vmatprep.subr.bf16.mxu0 %v2774_v57 }
  0xfc   :  { %1290 = vmatpush1.bf16.msra.mxu0 %v2772_v58  ;;  %v2813_v58 = vld [vmem:[#allocation8 + $0xb0] sm:$0xff]  }
  0xfd   :  { %1291 = vmatprep.subr.bf16.mxu0 %v2777_v59  ;;  %v2814_v59 = vld [vmem:[#allocation8 + $0xf8] sm:$0xff]  }
 0x100   :  { %1292 = vmatpush1.bf16.msra.mxu0 %v2775_v60 }
 0x101   :  { %1293 = vmatprep.subr.bf16.mxu0 %v2780_v61  ;;  %v2815_v61 = vld [vmem:[#allocation8 + $0xb8] sm:$0xff]  }
 0x104   :  { %1294 = vmatpush1.bf16.msra.mxu0 %v2778_v62  ;;  %v2818_v62 = vld [vmem:[#allocation8 + $0x1c0] sm:$0xff]  }
 0x105   :  { %1295 = vmatprep.subr.bf16.mxu0 %v2783_v63 }
 0x108   :  { %1296 = vmatpush1.bf16.msra.mxu0 %v2781_v1  ;;  %v2819_v1 = vld [vmem:[#allocation8 + $0x180] sm:$0xff]  }
 0x109   :  { %2469 = vmatprep.subr.bf16.mxu0 %v2816_v2  ;;  %v2822_v2 = vld [vmem:[#allocation8 + $0x1c8] sm:$0xff]  }
 0x10b   :  { %1298 = vmatmul.mubr.bf16.vlgmr.msra.gmra.mrb[8].mxu0 %v3083_v9  ;;  %v2840_v9 = vld [vmem:[#allocation8 + $0x170] sm:$0xff]  }
 0x10c   :  { %2470 = vmatpush3.bf16.msra.mxu0 %v2817_v3  ;;  %v2823_v3 = vld [vmem:[#allocation8 + $0x188] sm:$0xff]  }
 0x10d   :  { %2471 = vmatprep.subr.bf16.mxu0 %v2820_v4  ;;  %v2826_v4 = vld [vmem:[#allocation8 + $0x1d0] sm:$0xff]  }
 0x110   :  { %2472 = vmatpush3.bf16.msra.mxu0 %v2821_v5  ;;  %v2827_v5 = vld [vmem:[#allocation8 + $0x190] sm:$0xff]  }
 0x111   :  { %2473 = vmatprep.subr.bf16.mxu0 %v2824_v6  ;;  %v2830_v6 = vld [vmem:[#allocation8 + $0x1d8] sm:$0xff]  }
 0x114   :  { %2474 = vmatpush3.bf16.msra.mxu0 %v2825_v7  ;;  %v2831_v7 = vld [vmem:[#allocation8 + $0x198] sm:$0xff]  }
 0x115   :  { %2475 = vmatprep.subr.bf16.mxu0 %v2828_v8  ;;  %v2834_v8 = vld [vmem:[#allocation8 + $0x1e0] sm:$0xff]  }
 0x118   :  { %2476 = vmatpush3.bf16.msra.mxu0 %v2829_v10  ;;  %v2835_v10 = vld [vmem:[#allocation8 + $0x1a0] sm:$0xff]  }
 0x119   :  { %2477 = vmatprep.subr.bf16.mxu0 %v2832_v11  ;;  %v2838_v11 = vld [vmem:[#allocation8 + $0x1e8] sm:$0xff]  }
 0x11c   :  { %2478 = vmatpush3.bf16.msra.mxu0 %v2833_v12  ;;  %v1069_v12 = vsub.s32 4, %v3069_v40 }
 0x11d   :  { %2479 = vmatprep.subr.bf16.mxu0 %v2836_v13  ;;  %v2839_v13 = vld [vmem:[#allocation8 + $0x1a8] sm:$0xff]  }
 0x120   :  { %2480 = vmatpush3.bf16.msra.mxu0 %v2837_v14  ;;  %v1073_v14 = vsub.s32 5, %v3069_v40 }
 0x121   :  { %2481 = vmatprep.subr.bf16.mxu0 %v2840_v9  ;;  %v1077_v9 = vsub.s32 6, %v3069_v40 }
 0x124   :  { %2482 = vmatpush3.bf16.msra.mxu0 %v2841_v15  ;;  %v2842_v15 = vld [vmem:[#allocation8 + $0x1f0] sm:$0xff]  }
 0x125   :  { %2483 = vmatprep.subr.bf16.mxu0 %v2844_v16  ;;  %v1081_v16 = vsub.s32 7, %v3069_v40  ;;  %v2847_v40 = vld [vmem:[#allocation8 + $0x1b8] sm:$0xff]  }
 0x128   :  { %2484 = vmatpush3.bf16.msra.mxu0 %v2845_v17  ;;  %v1070_v17 = vrot.slane %v3093_v19, %v1069_v12 }
 0x129   :  { %2513 = vmatprep.subr.bf16.mxu0 %v2848_v18  ;;  %v1074_v18 = vrot.slane %v3093_v19, %v1073_v14 }
 0x15e   :  { %v1135_v23 = vpop.f32.mrb[0].mxu0 }
 0x15f   :  { %v1136_v25 = vadd.f32 %v1135_v23, %v1054_v21  ;;  %v1137_v26 = vpop.f32.mrb[1].mxu0  ;;  %v1078_v21 = vrot.slane %v3093_v19, %v1077_v9 }
 0x160   :  { %v1138_v27 = vadd.f32 %v1137_v26, %v1058_v22  ;;  %v1139_v28 = vpop.f32.mrb[2].mxu0  ;;  %v1176_v29 = vpop.f32.mrb[0].mxu1  ;;  %v2846_v22 = vld [vmem:[#allocation8 + $0x1f8] sm:$0xff]  }
 0x161   :  { %v1306_v30 = vmax.f32 %v1136_v25, 0.0  ;;  %v1140_v54 = vpop.f32.mrb[3].mxu0  ;;  %v1178_v31 = vpop.f32.mrb[1].mxu1  ;;  %v1177_v57 = vadd.f32 %v1176_v29, %v1062_v53  ;;  %v2858_v53 = vld [vmem:[#allocation8 + $0x268] sm:$0xff]  }
 0x162   :  { %v1307_v32 = vmax.f32 %v1138_v27, 0.0  ;;  %v1179_v33 = vadd.f32 %v1178_v31, %v1066_v24  ;;  %v1180_v34 = vpop.f32.mrb[2].mxu1  ;;  %v1082_v24 = vrot.slane %v3093_v19, %v1081_v16 }
 0x163   :  { %v1316_v35 = vpack.c.bf16 %v1306_v30, %v1306_v30  ;;  %v1181_v36 = vpop.f32.mrb[3].mxu1  ;;  %v1308_v60 = vmax.f32 %v1177_v57, 0.0  ;;  %v2861_v57 = vld [vmem:[#allocation8 + $0x230] sm:$0xff]  }
 0x164   :  { %v1317_v37 = vpack.c.bf16 %v1307_v32, %v1307_v32  ;;  %v1309_v39 = vmax.f32 %v1179_v33, 0.0 }
 0x165   :  { %v1318_v63 = vpack.c.bf16 %v1308_v60, %v1308_v60  ;;  %v248_v60 = vld [vmem:[#allocation7 + $0x8] sm:$0x3] }
 0x166   :  { %1999 = vmatprep.mubr.bf16.mxu1 %v1317_v37  ;;  %v1319_v42 = vpack.c.bf16 %v1309_v39, %v1309_v39 }
 0x167   :  { %2000 = vmatmul.mubr.bf16.vlgmr.msra.gmra.mrb[8].mxu1 %v1316_v35 }
 0x168   :  { %2448 = vmatpush3.bf16.msra.mxu1 %v2801_v38  ;;  %2039 = vmatprep.mubr.bf16.mxu1 %v1319_v42 }
 0x169   :  { %2449 = vmatprep.subr.bf16.mxu1 %v2802_v41  ;;  %v2849_v41 = vld [vmem:[#allocation8 + $0x200] sm:$0xff]  }
 0x16c   :  { %2450 = vmatpush3.bf16.msra.mxu1 %v2803_v43  ;;  %v2850_v43 = vld [vmem:[#allocation8 + $0x248] sm:$0xff]  }
 0x16d   :  { %2451 = vmatprep.subr.bf16.mxu1 %v2804_v44 }
 0x170   :  { %2452 = vmatpush3.bf16.msra.mxu1 %v2805_v46  ;;  %v2851_v46 = vld [vmem:[#allocation8 + $0x208] sm:$0xff]  }
 0x171   :  { %2453 = vmatprep.subr.bf16.mxu1 %v2806_v47  ;;  %v2852_v47 = vld [vmem:[#allocation8 + $0x250] sm:$0xff]  }
 0x174   :  { %2454 = vmatpush3.bf16.msra.mxu1 %v2807_v48  ;;  %v2853_v48 = vld [vmem:[#allocation8 + $0x210] sm:$0xff]  }
 0x175   :  { %2455 = vmatprep.subr.bf16.mxu1 %v2808_v49  ;;  %v2854_v49 = vld [vmem:[#allocation8 + $0x258] sm:$0xff]  }
 0x178   :  { %2456 = vmatpush3.bf16.msra.mxu1 %v2809_v51  ;;  %v2856_v51 = vld [vmem:[#allocation8 + $0x260] sm:$0xff]  }
 0x179   :  { %2457 = vmatprep.subr.bf16.mxu1 %v2810_v52  ;;  %v2857_v52 = vld [vmem:[#allocation8 + $0x220] sm:$0xff]  }
 0x17c   :  { %2458 = vmatpush3.bf16.msra.mxu1 %v2811_v55  ;;  %v2859_v55 = vld [vmem:[#allocation8 + $0x228] sm:$0xff]  }
 0x17d   :  { %2459 = vmatprep.subr.bf16.mxu1 %v2812_v56  ;;  %v2860_v56 = vld [vmem:[#allocation8 + $0x270] sm:$0xff]  }
 0x180   :  { %2460 = vmatpush3.bf16.msra.mxu1 %v2813_v58  ;;  %v2862_v58 = vld [vmem:[#allocation8 + $0x278] sm:$0xff]  }
 0x181   :  { %2461 = vmatprep.subr.bf16.mxu1 %v2814_v59  ;;  %v2863_v59 = vld [vmem:[#allocation8 + $0x238] sm:$0xff]  }
 0x184   :  { %2462 = vmatpush3.bf16.msra.mxu1 %v2815_v61  ;;  %v1086_v61 = vrot.slane %v248_v60, %v3080_v0 }
 0x185   :  { %2491 = vmatprep.subr.bf16.mxu1 %v2818_v62  ;;  %v1090_v62 = vrot.slane %v248_v60, %v3072_v45  ;;  %v1486_v45 = vld [vmem:[%s3132_s4] sm:$0x1]  ;;  %s2990_s4 = smov [#allocation10]  }
 0x186   :  { %s2174_s1 = sshll.u32 %s2990_s4, 4  ;;  %s2175_s1 = int_to_ptr.vmem [resolvable:$true] %s2174_s1 }
 0x187   :  { %2040 = vmatmul.mubr.bf16.vlgmr.msra.gmra.mrb[12].mxu1 %v1318_v63  ;;  %s2952_s18 = scalar_lea.vmem %s2175_s1, 16  ;;  %s2956_s19 = scalar_lea.vmem %s2175_s1, 32 }
 0x188   :  { %2492 = vmatpush3.bf16.msra.mxu1 %v2819_v1  ;;  %p2953_p4 = scmp.ne.s32.totalorder %s2175_s1, %s2952_s18  ;;  %p2957_p5 = scmp.lt.s32.totalorder %s2175_s1, %s2175_s1 }
 0x189   :  { %2493 = vmatprep.subr.bf16.mxu1 %v2822_v2  ;;  %p2958_p6 = scmp.lt.s32.totalorder %s2956_s19, %s2952_s18 }
 0x18b   :  { %p2959_p7 = por %p2958_p6, %p2957_p5 }
 0x18c   :  { %2494 = vmatpush3.bf16.msra.mxu1 %v2823_v3 }
 0x18d   :  { %2495 = vmatprep.subr.bf16.mxu1 %v2826_v4  ;;  %p2960_p8 = pnand %p2959_p7, %p2953_p4 }
 0x190   :  { %2496 = vmatpush3.bf16.msra.mxu1 %v2827_v5 }
 0x191   :  { %2497 = vmatprep.subr.bf16.mxu1 %v2830_v6 }
 0x194   :  { %2498 = vmatpush3.bf16.msra.mxu1 %v2831_v7 }
 0x195   :  { %2499 = vmatprep.subr.bf16.mxu1 %v2834_v8 }
 0x198   :  { %2500 = vmatpush3.bf16.msra.mxu1 %v2835_v10 }
 0x199   :  { %2501 = vmatprep.subr.bf16.mxu1 %v2838_v11 }
 0x19c   :  { %2502 = vmatpush3.bf16.msra.mxu1 %v2839_v13 }
 0x19d   :  { %2503 = vmatprep.subr.bf16.mxu1 %v2842_v15 }
 0x19e   :  { %v1217_v23 = vpop.f32.mrb[4].mxu0 }
 0x19f   :  { %v1218_v25 = vadd.f32 %v1217_v23, %v1070_v17  ;;  %v1219_v26 = vpop.f32.mrb[5].mxu0 }
 0x1a0   :  { %v1220_v27 = vadd.f32 %v1219_v26, %v1074_v18  ;;  %v1221_v28 = vpop.f32.mrb[6].mxu0  ;;  %v1258_v29 = vpop.f32.mrb[4].mxu1  ;;  %2504 = vmatpush3.bf16.msra.mxu1 %v2843_v20 }
 0x1a1   :  { %v1310_v30 = vmax.f32 %v1218_v25, 0.0  ;;  %v1259_v54 = vadd.f32 %v1258_v29, %v1078_v21  ;;  %v1222_v31 = vpop.f32.mrb[7].mxu0  ;;  %v1260_v32 = vpop.f32.mrb[5].mxu1  ;;  %2505 = vmatprep.subr.bf16.mxu1 %v2846_v22 }
 0x1a2   :  { %v1311_v33 = vmax.f32 %v1220_v27, 0.0  ;;  %v1261_v34 = vadd.f32 %v1260_v32, %v1082_v24  ;;  %v1262_v35 = vpop.f32.mrb[6].mxu1 }
 0x1a3   :  { %v1320_v36 = vpack.c.bf16 %v1310_v30, %v1310_v30  ;;  %v1312_v37 = vmax.f32 %v1259_v54, 0.0  ;;  %v1263_v38 = vpop.f32.mrb[7].mxu1 }
 0x1a4   :  { %v1321_v39 = vpack.c.bf16 %v1311_v33, %v1311_v33  ;;  %v1313_v19 = vmax.f32 %v1261_v34, 0.0  ;;  %2506 = vmatpush3.bf16.msra.mxu1 %v2847_v40 }
 0x1a5   :  { %v1322_v42 = vpack.c.bf16 %v1312_v37, %v1312_v37 }
 0x1a6   :  { %v1323_v44 = vpack.c.bf16 %v1313_v19, %v1313_v19  ;;  %2079 = vmatprep.mubr.bf16.mxu0 %v1321_v39 }
 0x1a7   :  { %2080 = vmatmul.mubr.bf16.vlgmr.msra.gmra.mrb[12].mxu0 %v1320_v36 }
 0x1a8   :  { %2119 = vmatprep.mubr.bf16.mxu1 %v1323_v44  ;;  %2514 = vmatpush3.bf16.msra.mxu0 %v2849_v41 }
 0x1a9   :  { %2120 = vmatmul.mubr.bf16.vlgmr.msra.gmra.mrb[16].mxu1 %v1322_v42  ;;  %2515 = vmatprep.subr.bf16.mxu0 %v2850_v43 }
 0x1ac   :  { %2516 = vmatpush3.bf16.msra.mxu0 %v2851_v46 }
 0x1ad   :  { %2517 = vmatprep.subr.bf16.mxu0 %v2852_v47 }
 0x1b0   :  { %2518 = vmatpush3.bf16.msra.mxu0 %v2853_v48 }
 0x1b1   :  { %2519 = vmatprep.subr.bf16.mxu0 %v2854_v49 }
 0x1b4   :  { %2520 = vmatpush3.bf16.msra.mxu0 %v2855_v50 }
 0x1b5   :  { %2521 = vmatprep.subr.bf16.mxu0 %v2856_v51 }
 0x1b8   :  { %2522 = vmatpush3.bf16.msra.mxu0 %v2857_v52 }
 0x1b9   :  { %2523 = vmatprep.subr.bf16.mxu0 %v2858_v53 }
 0x1bc   :  { %2524 = vmatpush3.bf16.msra.mxu0 %v2859_v55 }
 0x1bd   :  { %2525 = vmatprep.subr.bf16.mxu0 %v2860_v56 }
 0x1c0   :  { %2526 = vmatpush3.bf16.msra.mxu0 %v2861_v57 }
 0x1c1   :  { %2527 = vmatprep.subr.bf16.mxu0 %v2862_v58 }
 0x1c4   :  { %2528 = vmatpush3.bf16.msra.mxu0 %v2863_v59 }
 0x1de   :  { %v1299_v63 = vpop.f32.mrb[8].mxu0 }
 0x1df   :  { %v1300_v1 = vadd.f32 %v1299_v63, %v1086_v61  ;;  %v1301_v2 = vpop.f32.mrb[9].mxu0 }
 0x1e0   :  { %v1302_v3 = vadd.f32 %v1301_v2, %v1090_v62  ;;  %v1303_v4 = vpop.f32.mrb[10].mxu0 }
 0x1e1   :  { %v1314_v5 = vmax.f32 %v1300_v1, 0.0  ;;  %v1304_v6 = vpop.f32.mrb[11].mxu0 }
 0x1e2   :  { %v1315_v7 = vmax.f32 %v1302_v3, 0.0 }
 0x1e3   :  { %v1324_v10 = vpack.c.bf16 %v1314_v5, %v1314_v5 }
 0x1e4   :  { %v1325_v8 = vpack.c.bf16 %v1315_v7, %v1315_v7 }
 0x1e6   :  { %2159 = vmatprep.mubr.bf16.mxu0 %v1325_v8 }
 0x1e7   :  { %2160 = vmatmul.mubr.bf16.vlgmr.msra.gmra.mrb[16].mxu0 %v1324_v10 }
 0x23a   :  { %v2441_v11 = vpop.f32.mrb[8].mxu1 }
 0x23b   :  { %v2442_v12 = vpop.f32.mrb[9].mxu1 }
 0x23c   :  { %v2443_v13 = vadd.f32 %v2442_v12, %v2441_v11  ;;  %v2444_v14 = vpop.f32.mrb[10].mxu1 }
 0x23d   :  { %v2445_v9 = vpop.f32.mrb[11].mxu1 }
 0x23e   :  { %v2002_v16 = vadd.f32 %v2443_v13, %v1486_v45 }
 0x25a   :  { %v2463_v0 = vpop.f32.mrb[12].mxu1 }
 0x25b   :  { %v2464_v15 = vpop.f32.mrb[13].mxu1 }
 0x25c   :  { %v2465_v17 = vadd.f32 %v2464_v15, %v2463_v0  ;;  %v2466_v18 = vpop.f32.mrb[14].mxu1 }
 0x25d   :  { %v2467_v20 = vpop.f32.mrb[15].mxu1 }
 0x25e   :  { %v2042_v21 = vadd.f32 %v2465_v17, %v2002_v16 }
 0x27a   :  { %v2485_v22 = vpop.f32.mrb[12].mxu0 }
 0x27b   :  { %v2486_v23 = vpop.f32.mrb[13].mxu0 }
 0x27c   :  { %v2487_v24 = vadd.f32 %v2486_v23, %v2485_v22  ;;  %v2488_v25 = vpop.f32.mrb[14].mxu0  ;;  %v2507_v26 = vpop.f32.mrb[16].mxu1 }
 0x27d   :  { %v2489_v27 = vpop.f32.mrb[15].mxu0  ;;  %v2508_v28 = vpop.f32.mrb[17].mxu1 }
 0x27e   :  { %v2082_v29 = vadd.f32 %v2487_v24, %v2042_v21  ;;  %v2509_v40 = vadd.f32 %v2508_v28, %v2507_v26  ;;  %v2510_v30 = vpop.f32.mrb[18].mxu1 }
 0x27f   :  { %v2511_v54 = vpop.f32.mrb[19].mxu1 }
 0x280   :  { %v2122_v31 = vadd.f32 %v2509_v40, %v2082_v29 }
 0x2ba   :  { %v2529_v32 = vpop.f32.mrb[16].mxu0 }
 0x2bb   :  { %v2530_v33 = vpop.f32.mrb[17].mxu0 }
 0x2bc   :  { %v2531_v34 = vadd.f32 %v2530_v33, %v2529_v32  ;;  %v2532_v35 = vpop.f32.mrb[18].mxu0 }
 0x2bd   :  { %v2533_v36 = vpop.f32.mrb[19].mxu0 }
 0x2be   :  { %v2162_v37 = vadd.f32 %v2531_v34, %v2122_v31 }
 0x2c0   :  { %2167 = vst [vmem:[#allocation10] sm:$0x1] %v2162_v37 }
 0x2c1   :  { %2963 = shalt.err (!%p2960_p8)
}
 0x2c2   :  { %s2964_s22 = scalar_lea.hbm %s3133_s5, 16 }
 0x2c3   :  { %p2965_p9 = scmp.ne.s32.totalorder %s3133_s5, %s2964_s22  ;;  %p2968_p10 = scmp.lt.u32.totalorder %s2964_s22, %s3133_s5 }
 0x2c5   :  { %p2970_p11 = pnand %p2968_p10, %p2965_p9 }
 0x2c7   :  { %2973 = shalt.err (!%p2970_p11)
}
 0x2c8   :  { %2177 = dma.vmem_to_hbm [thread:$0]  %s2175_s1, 16, %s3133_s5, [#allocation4]  }
 0x2c9   :  { %2980 = dma.done.wait [#allocation4], 16  }
 0x2ca   :  { %2981 = vsyncadd [#allocation4], 4294967280 }
 0x2cb   :  { %2181 = vsyncpa [#allocation3], 1 }
 0x2cc   :  { %2182 = vsyncpa [#allocation6], 1 }
 0x2cd   :  { %2183 = vsyncpa [#allocation9], 1 }
 0x2ce   :  { %2184 = vsyncpa [#allocation4], 1 }

</bundles_post_ra>
